<compile_context>
chip_gen: v7x
topology: tpu7x:2x2x1
jax: 0.10.0
libtpu: 0.0.40
codegen_flags: <defaults>
</compile_context>

<pallas_src>
import itertools

import jax
import jax.numpy as jnp
from jax.experimental import pallas as pl
from jax.experimental.pallas import tpu as pltpu

# ----------------------------- constants (match the PyTorch module) ----------
ALL_PLAYERS = ['england', 'france', 'germany', 'italy', 'austria', 'russia', 'turkey']
NUM_PLAYERS = len(ALL_PLAYERS)                                   # 7
PLAYER_PAIRS = sorted([tuple(sorted(p)) for p in itertools.combinations(ALL_PLAYERS, 2)])
NUM_EDGES = len(PLAYER_PAIRS)                                    # 21
PAIR_TO_EDGE_IDX = {pair: i for i, pair in enumerate(PLAYER_PAIRS)}

OUT_PAD = 128       # lane-dense padded width for strengths output (>= NUM_EDGES)
CLS_PAD = 128       # lane-dense padded width for logits output (>= num_classes)


def get_relationship_index(sender_name, receiver_name):
    pair = tuple(sorted((sender_name, receiver_name)))
    return PAIR_TO_EDGE_IDX.get(pair, None)


def _pick_batch_tile(batch_rounded8):
    """Batch-tile (M dim) heuristic per chip family.

    <=128 rows: one tile, no wasted padding rows.
    <512 rows : 128-row tiles -> grid >= 2 (both TCs on v7x), full 128-row MXU (v5e).
    >=512 rows: 256-row tiles -> fills the 2x256-row MXU on v6e/v7x.
    """
    if batch_rounded8 <= 128:
        return batch_rounded8
    if batch_rounded8 < 512:
        return 128
    return 256


# ----------------------------- fused Pallas kernel ---------------------------
def fused_forward_kernel(ids_ref, mask_ref, seq_ref, eidx_ref, ts_ref,
                         emb_ref, pooler_w_ref, pooler_b_ref,
                         w_ih_ref, w_hh_ref, b_g_ref,
                         fc_w_ref, fc_b_ref,
                         w_text_ref, w_scores_ref, w_str_ref, w_ts_ref,
                         clf_b_ref,
                         strengths_ref, logits_ref,
                         xp_scr):
    f32 = jnp.float32
    bf16 = jnp.bfloat16

    T, B, Din = seq_ref.shape              # sequences arrive as (T, B, Din)
    H = w_hh_ref.shape[0]
    S = ids_ref.shape[1]
    V, Hb = emb_ref.shape

    # ---------------- RelationshipLSTM --------------------------------------
    # Hoisted input projection: one matmul per timestep over the gate-stacked
    # weight (Din, 4H); bias folded here.  Result lives in VMEM scratch laid
    # out (T, B, 4H) so each recurrence step reads a leading-axis slab.
    w_ih = w_ih_ref[...]                   # (Din, 4H) bf16
    b_g = b_g_ref[...]                     # (1, 4H)   f32
    for t in range(T):                     # T small & static: unrolled
        xp_scr[t] = (jnp.dot(seq_ref[t].astype(bf16), w_ih,
                             preferred_element_type=f32) + b_g)

    # Recurrence: one h @ (H, 4H) matmul per step; gate order [i | f | o | g].
    w_hh = w_hh_ref[...]                   # (H, 4H) bf16
    h = jnp.zeros((B, H), f32)
    c = jnp.zeros((B, H), f32)
    for t in range(T):
        pre = xp_scr[t] + jnp.dot(h.astype(bf16), w_hh,
                                  preferred_element_type=f32)    # (B, 4H) f32
        sig = jax.nn.sigmoid(pre[:, :3 * H])                     # [i|f|o] in one go
        i_g = sig[:, :H]
        f_g = sig[:, H:2 * H]
        o_g = sig[:, 2 * H:]
        g_g = jnp.tanh(pre[:, 3 * H:])
        c = f_g * c + i_g * g_g
        h = o_g * jnp.tanh(c)

    # fc: lane-dense padded output (first NUM_EDGES columns are real)
    strengths = (jnp.dot(h.astype(bf16), fc_w_ref[...],
                         preferred_element_type=f32) + fc_b_ref[...])   # (B, OUT_PAD)
    strengths_ref[...] = strengths

    # ---------------- BERT surrogate pooling --------------------------------
    # TODO(synk): pretrained BERT encoder replaced by an embedding-lookup +
    # attention-mask-weighted mean + tanh pooler dense surrogate.
    ids = ids_ref[...]                                           # (B, S) int32
    mask = mask_ref[...]                                         # (B, S) f32
    denom = jnp.maximum(jnp.sum(mask, axis=1, keepdims=True), 1.0)
    inv = pl.reciprocal(denom, approx=True)                      # EUP slot (free)
    if V <= 256:
        # toy vocab: one-hot token-count matmul keeps everything in-kernel
        vocab_iota = jax.lax.broadcasted_iota(jnp.int32, (B, S, V), 2)
        onehot = (ids[:, :, None] == vocab_iota).astype(f32)     # (B, S, V)
        counts = jnp.sum(onehot * mask[:, :, None], axis=1)      # (B, V)
        mean_emb = jnp.dot((counts * inv).astype(bf16), emb_ref[...],
                           preferred_element_type=f32)           # (B, Hb)
    else:
        # TODO(synk): real-vocab path (one-hot would be O(B*S*V) and blow VMEM);
        # per-token row gather + mask-weighted mean.
        tok = jnp.take(emb_ref[...], ids.reshape(B * S), axis=0).reshape(B, S, Hb)
        mean_emb = jnp.sum(tok.astype(f32) * mask[:, :, None], axis=1) * inv
    pooled = jnp.tanh(
        jnp.dot(mean_emb.astype(bf16), pooler_w_ref[...],
                preferred_element_type=f32) + pooler_b_ref[...]) # (B, Hb)

    # ---------------- edge-strength gather + fused classifier ---------------
    eidx = eidx_ref[...]                                         # (B, 1) int32
    col = jax.lax.broadcasted_iota(jnp.int32, strengths.shape, 1)
    sel = jnp.logical_and(col == eidx, eidx >= 0)
    strength = jnp.sum(jnp.where(sel, strengths, 0.0), axis=1, keepdims=True)

    scores = seq_ref[0][:, :NUM_PLAYERS]                         # (B, 7) f32

    # classifier weight pre-split along the concat axis:
    # concat([text, scores, strength, ts]) @ W + b  ==  sum of partial matmuls.
    logits = (jnp.dot(pooled.astype(bf16), w_text_ref[...],
                      preferred_element_type=f32)
              + jnp.dot(scores.astype(bf16), w_scores_ref[...],
                        preferred_element_type=f32)
              + strength * w_str_ref[...]                        # (B,1)*(1,CLS_PAD)
              + ts_ref[...] * w_ts_ref[...]                      # (B,1)*(1,CLS_PAD)
              + clf_b_ref[...])                                  # (B, CLS_PAD)
    logits_ref[...] = logits


# ----------------------------- pallas_call wrapper ---------------------------
def fused_forward(ids, mask, seq_t, eidx, ts, params, tile):
    B_pad = ids.shape[0]
    assert B_pad % tile == 0
    T, _, _ = seq_t.shape
    H4 = params["w_hh"].shape[1]
    grid = (B_pad // tile,)

    def bspec(shape, batch_axis=0):
        nd = len(shape)
        block = list(shape)
        block[batch_axis] = tile

        def idx(b, _ax=batch_axis, _nd=nd):
            out = [0] * _nd
            out[_ax] = b
            return tuple(out)

        return pl.BlockSpec(tuple(block), idx)

    def wspec(shape):
        nd = len(shape)
        return pl.BlockSpec(tuple(shape), lambda b, _nd=nd: (0,) * _nd)

    batched = [ids, mask, seq_t, eidx, ts]
    batched_axes = [0, 0, 1, 0, 0]              # seq_t is (T, B, Din): batch on axis 1
    weight_names = ("emb_table", "pooler_w", "pooler_b",
                    "w_ih", "w_hh", "b_g", "fc_w", "fc_b",
                    "w_text", "w_scores", "w_str", "w_ts", "clf_b")
    weights = [params[k] for k in weight_names]

    in_specs = ([bspec(x.shape, ax) for x, ax in zip(batched, batched_axes)]
                + [wspec(w.shape) for w in weights])
    out_shape = (jax.ShapeDtypeStruct((B_pad, OUT_PAD), jnp.float32),
                 jax.ShapeDtypeStruct((B_pad, CLS_PAD), jnp.float32))
    out_specs = (bspec((B_pad, OUT_PAD)), bspec((B_pad, CLS_PAD)))

    return pl.pallas_call(
        fused_forward_kernel,
        out_shape=out_shape,
        grid=grid,
        in_specs=in_specs,
        out_specs=out_specs,
        scratch_shapes=[pltpu.VMEM((T, tile, H4), jnp.float32)],   # hoisted x-proj
        compiler_params=pltpu.CompilerParams(
            dimension_semantics=("parallel",)),   # batch tiles -> both TCs on v7x
    )(*batched, *weights)


def diplomacy_graph_model_forward(params, input_ids, attention_mask, sequences,
                                  sender_names, receiver_names, timestamps):
    """Mirrors DiplomacyGraphModel.forward (dropout = identity / eval mode)."""
    B = input_ids.shape[0]
    B8 = ((B + 7) // 8) * 8
    tile = _pick_batch_tile(B8)
    B_pad = ((B8 + tile - 1) // tile) * tile

    # host-side edge index lookup (python strings, as in the PyTorch loop)
    edge_indices = []
    for i in range(B):
        e = get_relationship_index(sender_names[i], receiver_names[i])
        edge_indices.append(e if e is not None else -1)
    eidx = jnp.asarray(edge_indices + [-1] * (B_pad - B),
                       dtype=jnp.int32).reshape(B_pad, 1)

    def pad_b(x, axis=0):
        p = B_pad - x.shape[axis]
        if p == 0:
            return x
        widths = [(0, 0)] * x.ndim
        widths[axis] = (0, p)
        return jnp.pad(x, widths)

    ids_p = pad_b(input_ids.astype(jnp.int32))
    mask_p = pad_b(attention_mask.astype(jnp.float32))
    # pass sequences as (T, B, Din): per-timestep operands are leading-axis slabs
    seq_t = pad_b(jnp.transpose(sequences.astype(jnp.float32), (1, 0, 2)), axis=1)
    ts_p = pad_b(timestamps.astype(jnp.float32))

    strengths_pad, logits_pad = fused_forward(ids_p, mask_p, seq_t, eidx, ts_p,
                                              params, tile)

    num_classes = params["num_classes"]
    logits = logits_pad[:B, :num_classes]
    strengths = strengths_pad[:B, :NUM_EDGES]
    edge_idx_out = jnp.asarray(edge_indices, dtype=jnp.int32)
    return logits, strengths, edge_idx_out


# ----------------------------- deterministic parameter init ------------------
def init_params(key, vocab=50, bert_dim=32, lstm_hidden=64, num_classes=2):
    din = NUM_PLAYERS + 3                                        # 10
    H = lstm_hidden
    ks = jax.random.split(key, 12)
    u = lambda k, s, scale=0.1: jax.random.uniform(k, s, jnp.float32, -scale, scale)

    # lane-dense padded output weights (padding columns are exact zeros)
    fc_w = jnp.zeros((H, OUT_PAD), jnp.float32).at[:, :NUM_EDGES].set(
        u(ks[6], (H, NUM_EDGES)))
    fc_b = jnp.zeros((1, OUT_PAD), jnp.float32).at[:, :NUM_EDGES].set(
        u(ks[7], (1, NUM_EDGES)))
    w_text = jnp.zeros((bert_dim, CLS_PAD), jnp.float32).at[:, :num_classes].set(
        u(ks[8], (bert_dim, num_classes)))
    w_scores = jnp.zeros((NUM_PLAYERS, CLS_PAD), jnp.float32).at[:, :num_classes].set(
        u(ks[9], (NUM_PLAYERS, num_classes)))
    w_str = jnp.zeros((1, CLS_PAD), jnp.float32).at[:, :num_classes].set(
        u(ks[10], (1, num_classes)))
    w_ts = jnp.zeros((1, CLS_PAD), jnp.float32).at[:, :num_classes].set(
        u(ks[11], (1, num_classes)))

    params = {
        # BERT surrogate
        "emb_table": u(ks[0], (vocab, bert_dim), 0.5).astype(jnp.bfloat16),
        "pooler_w": u(ks[1], (bert_dim, bert_dim)).astype(jnp.bfloat16),
        "pooler_b": u(ks[2], (1, bert_dim)),
        # LSTM weights stacked along the OUTPUT axis, gate order [i | f | o | g];
        # matmul operands in bf16, biases (b_ih + b_hh folded) in f32.
        "w_ih": u(ks[3], (din, 4 * H)).astype(jnp.bfloat16),
        "w_hh": u(ks[4], (H, 4 * H)).astype(jnp.bfloat16),
        "b_g": u(ks[5], (1, 4 * H)),
        "fc_w": fc_w.astype(jnp.bfloat16),
        "fc_b": fc_b,
        # classifier split along the concatenated-feature axis:
        # [bert_dim | NUM_PLAYERS | 1 (strength) | 1 (timestamp)] -> num_classes
        "w_text": w_text.astype(jnp.bfloat16),
        "w_scores": w_scores.astype(jnp.bfloat16),
        "w_str": w_str,
        "w_ts": w_ts,
        "clf_b": jnp.zeros((1, CLS_PAD), jnp.float32),
        "num_classes": num_classes,
    }
    return params


# ----------------------------- demo ------------------------------------------
if __name__ == "__main__":
    key = jax.random.PRNGKey(0)
    kp, k1, k2, k3, k4 = jax.random.split(key, 5)

    B, S, T = 2, 8, 5
    VOCAB, BERT_DIM = 50, 32

    params = init_params(kp, vocab=VOCAB, bert_dim=BERT_DIM)

    input_ids = jax.random.randint(k1, (B, S), 0, VOCAB, dtype=jnp.int32)
    attention_mask = jnp.concatenate(
        [jnp.ones((B, S - 2), jnp.int32), jnp.zeros((B, 2), jnp.int32)], axis=1)
    sequences = jax.random.normal(k2, (B, T, NUM_PLAYERS + 3), jnp.float32)
    timestamps = jax.random.uniform(k3, (B, 1), jnp.float32)
    sender_names = ['england', 'austria']
    receiver_names = ['france', 'russia']

    logits, strengths, edge_indices = diplomacy_graph_model_forward(
        params, input_ids, attention_mask, sequences,
        sender_names, receiver_names, timestamps)

    jax.block_until_ready((logits, strengths, edge_indices))

    assert logits.shape == (B, 2)
    assert strengths.shape == (B, NUM_EDGES)
    assert edge_indices.shape == (B,)
    assert bool(jnp.all(jnp.isfinite(logits)))
    assert bool(jnp.all(jnp.isfinite(strengths)))
    print("KERNEL_OK")
</pallas_src>

<mosaic_0001>
module attributes {stable_mosaic.version = 11 : i64} {
  func.func @fused_forward_kernel(%arg0: i32, %arg1: memref<8x8xi32, #tpu.memory_space<vmem>>, %arg2: memref<8x8xf32, #tpu.memory_space<vmem>>, %arg3: memref<5x8x10xf32, #tpu.memory_space<vmem>>, %arg4: memref<8x1xi32, #tpu.memory_space<vmem>>, %arg5: memref<8x1xf32, #tpu.memory_space<vmem>>, %arg6: memref<50x32xbf16, #tpu.memory_space<vmem>>, %arg7: memref<32x32xbf16, #tpu.memory_space<vmem>>, %arg8: memref<1x32xf32, #tpu.memory_space<vmem>>, %arg9: memref<10x256xbf16, #tpu.memory_space<vmem>>, %arg10: memref<64x256xbf16, #tpu.memory_space<vmem>>, %arg11: memref<1x256xf32, #tpu.memory_space<vmem>>, %arg12: memref<64x128xbf16, #tpu.memory_space<vmem>>, %arg13: memref<1x128xf32, #tpu.memory_space<vmem>>, %arg14: memref<32x128xbf16, #tpu.memory_space<vmem>>, %arg15: memref<7x128xbf16, #tpu.memory_space<vmem>>, %arg16: memref<1x128xf32, #tpu.memory_space<vmem>>, %arg17: memref<1x128xf32, #tpu.memory_space<vmem>>, %arg18: memref<1x128xf32, #tpu.memory_space<vmem>>, %arg19: memref<8x128xf32, #tpu.memory_space<vmem>>, %arg20: memref<8x128xf32, #tpu.memory_space<vmem>>, %arg21: memref<5x8x256xf32, #tpu.memory_space<vmem>>) attributes {dimension_semantics = [#tpu.dimension_semantics<parallel>], iteration_bounds = array<i64: 1>, scalar_prefetch = 0 : i64, scratch_operands = 1 : i64, tpu.core_type = #tpu.core_type<tc>, window_params = [{transform_indices = @transform_0, window_bounds = array<i64: 8, 8>}, {transform_indices = @transform_1, window_bounds = array<i64: 8, 8>}, {transform_indices = @transform_2, window_bounds = array<i64: 5, 8, 10>}, {transform_indices = @transform_3, window_bounds = array<i64: 8, 1>}, {transform_indices = @transform_4, window_bounds = array<i64: 8, 1>}, {pipeline_mode = #tpu.pipeline_mode<synchronous>, transform_indices = @transform_5, window_bounds = array<i64: 50, 32>}, {pipeline_mode = #tpu.pipeline_mode<synchronous>, transform_indices = @transform_6, window_bounds = array<i64: 32, 32>}, {pipeline_mode = #tpu.pipeline_mode<synchronous>, transform_indices = @transform_7, window_bounds = array<i64: 1, 32>}, {pipeline_mode = #tpu.pipeline_mode<synchronous>, transform_indices = @transform_8, window_bounds = array<i64: 10, 256>}, {pipeline_mode = #tpu.pipeline_mode<synchronous>, transform_indices = @transform_9, window_bounds = array<i64: 64, 256>}, {pipeline_mode = #tpu.pipeline_mode<synchronous>, transform_indices = @transform_10, window_bounds = array<i64: 1, 256>}, {pipeline_mode = #tpu.pipeline_mode<synchronous>, transform_indices = @transform_11, window_bounds = array<i64: 64, 128>}, {pipeline_mode = #tpu.pipeline_mode<synchronous>, transform_indices = @transform_12, window_bounds = array<i64: 1, 128>}, {pipeline_mode = #tpu.pipeline_mode<synchronous>, transform_indices = @transform_13, window_bounds = array<i64: 32, 128>}, {pipeline_mode = #tpu.pipeline_mode<synchronous>, transform_indices = @transform_14, window_bounds = array<i64: 7, 128>}, {pipeline_mode = #tpu.pipeline_mode<synchronous>, transform_indices = @transform_15, window_bounds = array<i64: 1, 128>}, {pipeline_mode = #tpu.pipeline_mode<synchronous>, transform_indices = @transform_16, window_bounds = array<i64: 1, 128>}, {pipeline_mode = #tpu.pipeline_mode<synchronous>, transform_indices = @transform_17, window_bounds = array<i64: 1, 128>}, {transform_indices = @transform_18, window_bounds = array<i64: 8, 128>}, {transform_indices = @transform_19, window_bounds = array<i64: 8, 128>}]} {
    %c0 = arith.constant 0 : index
    %c0_0 = arith.constant 0 : index
    %0 = vector.load %arg9[%c0, %c0_0] : memref<10x256xbf16, #tpu.memory_space<vmem>>, vector<10x256xbf16>
    %c0_1 = arith.constant 0 : index
    %c0_2 = arith.constant 0 : index
    %1 = vector.load %arg11[%c0_1, %c0_2] : memref<1x256xf32, #tpu.memory_space<vmem>>, vector<1x256xf32>
    %c0_3 = arith.constant 0 : index
    %c0_4 = arith.constant 0 : index
    %c0_5 = arith.constant 0 : index
    %2 = vector.load %arg3[%c0_3, %c0_4, %c0_5] : memref<5x8x10xf32, #tpu.memory_space<vmem>>, vector<1x8x10xf32>
    %3 = vector.shape_cast %2 : vector<1x8x10xf32> to vector<8x10xf32>
    %4 = arith.truncf %3 : vector<8x10xf32> to vector<8x10xbf16>
    %cst = arith.constant dense<0.000000e+00> : vector<8x256xf32>
    %5 = tpu.matmul %4, %0, %cst {dimension_numbers = #tpu.dot_dimension_numbers<[1], [0], [0], [1], [0, 0, 1, 1], [], []>} : vector<8x10xbf16>, vector<10x256xbf16>, vector<8x256xf32> -> vector<8x256xf32>
    %6 = vector.broadcast %1 : vector<1x256xf32> to vector<8x256xf32>
    %7 = arith.addf %5, %6 : vector<8x256xf32>
    %c0_6 = arith.constant 0 : index
    %c0_7 = arith.constant 0 : index
    %c0_8 = arith.constant 0 : index
    %8 = vector.load %arg21[%c0_6, %c0_7, %c0_8] : memref<5x8x256xf32, #tpu.memory_space<vmem>>, vector<1x8x256xf32>
    %9 = vector.shape_cast %8 : vector<1x8x256xf32> to vector<8x256xf32>
    %10 = vector.shape_cast %7 : vector<8x256xf32> to vector<1x8x256xf32>
    tpu.vector_store %arg21[%c0_6, %c0_7, %c0_8], %10 {strides = array<i32>} : memref<5x8x256xf32, #tpu.memory_space<vmem>>, vector<1x8x256xf32>,
    %c1 = arith.constant 1 : index
    %c0_9 = arith.constant 0 : index
    %c0_10 = arith.constant 0 : index
    %11 = vector.load %arg3[%c1, %c0_9, %c0_10] : memref<5x8x10xf32, #tpu.memory_space<vmem>>, vector<1x8x10xf32>
    %12 = vector.shape_cast %11 : vector<1x8x10xf32> to vector<8x10xf32>
    %13 = arith.truncf %12 : vector<8x10xf32> to vector<8x10xbf16>
    %cst_11 = arith.constant dense<0.000000e+00> : vector<8x256xf32>
    %14 = tpu.matmul %13, %0, %cst_11 {dimension_numbers = #tpu.dot_dimension_numbers<[1], [0], [0], [1], [0, 0, 1, 1], [], []>} : vector<8x10xbf16>, vector<10x256xbf16>, vector<8x256xf32> -> vector<8x256xf32>
    %15 = vector.broadcast %1 : vector<1x256xf32> to vector<8x256xf32>
    %16 = arith.addf %14, %15 : vector<8x256xf32>
    %c1_12 = arith.constant 1 : index
    %c0_13 = arith.constant 0 : index
    %c0_14 = arith.constant 0 : index
    %17 = vector.load %arg21[%c1_12, %c0_13, %c0_14] : memref<5x8x256xf32, #tpu.memory_space<vmem>>, vector<1x8x256xf32>
    %18 = vector.shape_cast %17 : vector<1x8x256xf32> to vector<8x256xf32>
    %19 = vector.shape_cast %16 : vector<8x256xf32> to vector<1x8x256xf32>
    tpu.vector_store %arg21[%c1_12, %c0_13, %c0_14], %19 {strides = array<i32>} : memref<5x8x256xf32, #tpu.memory_space<vmem>>, vector<1x8x256xf32>,
    %c2 = arith.constant 2 : index
    %c0_15 = arith.constant 0 : index
    %c0_16 = arith.constant 0 : index
    %20 = vector.load %arg3[%c2, %c0_15, %c0_16] : memref<5x8x10xf32, #tpu.memory_space<vmem>>, vector<1x8x10xf32>
    %21 = vector.shape_cast %20 : vector<1x8x10xf32> to vector<8x10xf32>
    %22 = arith.truncf %21 : vector<8x10xf32> to vector<8x10xbf16>
    %cst_17 = arith.constant dense<0.000000e+00> : vector<8x256xf32>
    %23 = tpu.matmul %22, %0, %cst_17 {dimension_numbers = #tpu.dot_dimension_numbers<[1], [0], [0], [1], [0, 0, 1, 1], [], []>} : vector<8x10xbf16>, vector<10x256xbf16>, vector<8x256xf32> -> vector<8x256xf32>
    %24 = vector.broadcast %1 : vector<1x256xf32> to vector<8x256xf32>
    %25 = arith.addf %23, %24 : vector<8x256xf32>
    %c2_18 = arith.constant 2 : index
    %c0_19 = arith.constant 0 : index
    %c0_20 = arith.constant 0 : index
    %26 = vector.load %arg21[%c2_18, %c0_19, %c0_20] : memref<5x8x256xf32, #tpu.memory_space<vmem>>, vector<1x8x256xf32>
    %27 = vector.shape_cast %26 : vector<1x8x256xf32> to vector<8x256xf32>
    %28 = vector.shape_cast %25 : vector<8x256xf32> to vector<1x8x256xf32>
    tpu.vector_store %arg21[%c2_18, %c0_19, %c0_20], %28 {strides = array<i32>} : memref<5x8x256xf32, #tpu.memory_space<vmem>>, vector<1x8x256xf32>,
    %c3 = arith.constant 3 : index
    %c0_21 = arith.constant 0 : index
    %c0_22 = arith.constant 0 : index
    %29 = vector.load %arg3[%c3, %c0_21, %c0_22] : memref<5x8x10xf32, #tpu.memory_space<vmem>>, vector<1x8x10xf32>
    %30 = vector.shape_cast %29 : vector<1x8x10xf32> to vector<8x10xf32>
    %31 = arith.truncf %30 : vector<8x10xf32> to vector<8x10xbf16>
    %cst_23 = arith.constant dense<0.000000e+00> : vector<8x256xf32>
    %32 = tpu.matmul %31, %0, %cst_23 {dimension_numbers = #tpu.dot_dimension_numbers<[1], [0], [0], [1], [0, 0, 1, 1], [], []>} : vector<8x10xbf16>, vector<10x256xbf16>, vector<8x256xf32> -> vector<8x256xf32>
    %33 = vector.broadcast %1 : vector<1x256xf32> to vector<8x256xf32>
    %34 = arith.addf %32, %33 : vector<8x256xf32>
    %c3_24 = arith.constant 3 : index
    %c0_25 = arith.constant 0 : index
    %c0_26 = arith.constant 0 : index
    %35 = vector.load %arg21[%c3_24, %c0_25, %c0_26] : memref<5x8x256xf32, #tpu.memory_space<vmem>>, vector<1x8x256xf32>
    %36 = vector.shape_cast %35 : vector<1x8x256xf32> to vector<8x256xf32>
    %37 = vector.shape_cast %34 : vector<8x256xf32> to vector<1x8x256xf32>
    tpu.vector_store %arg21[%c3_24, %c0_25, %c0_26], %37 {strides = array<i32>} : memref<5x8x256xf32, #tpu.memory_space<vmem>>, vector<1x8x256xf32>,
    %c4 = arith.constant 4 : index
    %c0_27 = arith.constant 0 : index
    %c0_28 = arith.constant 0 : index
    %38 = vector.load %arg3[%c4, %c0_27, %c0_28] : memref<5x8x10xf32, #tpu.memory_space<vmem>>, vector<1x8x10xf32>
    %39 = vector.shape_cast %38 : vector<1x8x10xf32> to vector<8x10xf32>
    %40 = arith.truncf %39 : vector<8x10xf32> to vector<8x10xbf16>
    %cst_29 = arith.constant dense<0.000000e+00> : vector<8x256xf32>
    %41 = tpu.matmul %40, %0, %cst_29 {dimension_numbers = #tpu.dot_dimension_numbers<[1], [0], [0], [1], [0, 0, 1, 1], [], []>} : vector<8x10xbf16>, vector<10x256xbf16>, vector<8x256xf32> -> vector<8x256xf32>
    %42 = vector.broadcast %1 : vector<1x256xf32> to vector<8x256xf32>
    %43 = arith.addf %41, %42 : vector<8x256xf32>
    %c4_30 = arith.constant 4 : index
    %c0_31 = arith.constant 0 : index
    %c0_32 = arith.constant 0 : index
    %44 = vector.load %arg21[%c4_30, %c0_31, %c0_32] : memref<5x8x256xf32, #tpu.memory_space<vmem>>, vector<1x8x256xf32>
    %45 = vector.shape_cast %44 : vector<1x8x256xf32> to vector<8x256xf32>
    %46 = vector.shape_cast %43 : vector<8x256xf32> to vector<1x8x256xf32>
    tpu.vector_store %arg21[%c4_30, %c0_31, %c0_32], %46 {strides = array<i32>} : memref<5x8x256xf32, #tpu.memory_space<vmem>>, vector<1x8x256xf32>,
    %c0_33 = arith.constant 0 : index
    %c0_34 = arith.constant 0 : index
    %47 = vector.load %arg10[%c0_33, %c0_34] : memref<64x256xbf16, #tpu.memory_space<vmem>>, vector<64x256xbf16>
    %cst_35 = arith.constant 0.000000e+00 : f32
    %48 = vector.broadcast %cst_35 : f32 to vector<8x64xf32>
    %cst_36 = arith.constant 0.000000e+00 : f32
    %49 = vector.broadcast %cst_36 : f32 to vector<8x64xf32>
    %c0_37 = arith.constant 0 : index
    %c0_38 = arith.constant 0 : index
    %c0_39 = arith.constant 0 : index
    %50 = vector.load %arg21[%c0_37, %c0_38, %c0_39] : memref<5x8x256xf32, #tpu.memory_space<vmem>>, vector<1x8x256xf32>
    %51 = vector.shape_cast %50 : vector<1x8x256xf32> to vector<8x256xf32>
    %52 = arith.truncf %48 : vector<8x64xf32> to vector<8x64xbf16>
    %cst_40 = arith.constant dense<0.000000e+00> : vector<8x256xf32>
    %53 = tpu.matmul %52, %47, %cst_40 {dimension_numbers = #tpu.dot_dimension_numbers<[1], [0], [0], [1], [0, 0, 1, 1], [], []>} : vector<8x64xbf16>, vector<64x256xbf16>, vector<8x256xf32> -> vector<8x256xf32>
    %54 = arith.addf %51, %53 : vector<8x256xf32>
    %55 = vector.extract_strided_slice %54 {offsets = [0, 0], sizes = [8, 192], strides = [1, 1]} : vector<8x256xf32> to vector<8x192xf32>
    %56 = arith.negf %55 : vector<8x192xf32>
    %57 = math.exp %56 : vector<8x192xf32>
    %cst_41 = arith.constant 1.000000e+00 : f32
    %58 = vector.broadcast %cst_41 : f32 to vector<8x192xf32>
    %59 = arith.addf %58, %57 : vector<8x192xf32>
    %60 = arith.divf %58, %59 : vector<8x192xf32>
    %61 = vector.extract_strided_slice %60 {offsets = [0, 0], sizes = [8, 64], strides = [1, 1]} : vector<8x192xf32> to vector<8x64xf32>
    %62 = vector.extract_strided_slice %60 {offsets = [0, 64], sizes = [8, 64], strides = [1, 1]} : vector<8x192xf32> to vector<8x64xf32>
    %63 = vector.extract_strided_slice %60 {offsets = [0, 128], sizes = [8, 64], strides = [1, 1]} : vector<8x192xf32> to vector<8x64xf32>
    %64 = vector.extract_strided_slice %54 {offsets = [0, 192], sizes = [8, 64], strides = [1, 1]} : vector<8x256xf32> to vector<8x64xf32>
    %65 = math.tanh %64 : vector<8x64xf32>
    %66 = arith.mulf %62, %49 : vector<8x64xf32>
    %67 = arith.mulf %61, %65 : vector<8x64xf32>
    %68 = arith.addf %66, %67 : vector<8x64xf32>
    %69 = math.tanh %68 : vector<8x64xf32>
    %70 = arith.mulf %63, %69 : vector<8x64xf32>
    %c1_42 = arith.constant 1 : index
    %c0_43 = arith.constant 0 : index
    %c0_44 = arith.constant 0 : index
    %71 = vector.load %arg21[%c1_42, %c0_43, %c0_44] : memref<5x8x256xf32, #tpu.memory_space<vmem>>, vector<1x8x256xf32>
    %72 = vector.shape_cast %71 : vector<1x8x256xf32> to vector<8x256xf32>
    %73 = arith.truncf %70 : vector<8x64xf32> to vector<8x64xbf16>
    %cst_45 = arith.constant dense<0.000000e+00> : vector<8x256xf32>
    %74 = tpu.matmul %73, %47, %cst_45 {dimension_numbers = #tpu.dot_dimension_numbers<[1], [0], [0], [1], [0, 0, 1, 1], [], []>} : vector<8x64xbf16>, vector<64x256xbf16>, vector<8x256xf32> -> vector<8x256xf32>
    %75 = arith.addf %72, %74 : vector<8x256xf32>
    %76 = vector.extract_strided_slice %75 {offsets = [0, 0], sizes = [8, 192], strides = [1, 1]} : vector<8x256xf32> to vector<8x192xf32>
    %77 = arith.negf %76 : vector<8x192xf32>
    %78 = math.exp %77 : vector<8x192xf32>
    %cst_46 = arith.constant 1.000000e+00 : f32
    %79 = vector.broadcast %cst_46 : f32 to vector<8x192xf32>
    %80 = arith.addf %79, %78 : vector<8x192xf32>
    %81 = arith.divf %79, %80 : vector<8x192xf32>
    %82 = vector.extract_strided_slice %81 {offsets = [0, 0], sizes = [8, 64], strides = [1, 1]} : vector<8x192xf32> to vector<8x64xf32>
    %83 = vector.extract_strided_slice %81 {offsets = [0, 64], sizes = [8, 64], strides = [1, 1]} : vector<8x192xf32> to vector<8x64xf32>
    %84 = vector.extract_strided_slice %81 {offsets = [0, 128], sizes = [8, 64], strides = [1, 1]} : vector<8x192xf32> to vector<8x64xf32>
    %85 = vector.extract_strided_slice %75 {offsets = [0, 192], sizes = [8, 64], strides = [1, 1]} : vector<8x256xf32> to vector<8x64xf32>
    %86 = math.tanh %85 : vector<8x64xf32>
    %87 = arith.mulf %83, %68 : vector<8x64xf32>
    %88 = arith.mulf %82, %86 : vector<8x64xf32>
    %89 = arith.addf %87, %88 : vector<8x64xf32>
    %90 = math.tanh %89 : vector<8x64xf32>
    %91 = arith.mulf %84, %90 : vector<8x64xf32>
    %c2_47 = arith.constant 2 : index
    %c0_48 = arith.constant 0 : index
    %c0_49 = arith.constant 0 : index
    %92 = vector.load %arg21[%c2_47, %c0_48, %c0_49] : memref<5x8x256xf32, #tpu.memory_space<vmem>>, vector<1x8x256xf32>
    %93 = vector.shape_cast %92 : vector<1x8x256xf32> to vector<8x256xf32>
    %94 = arith.truncf %91 : vector<8x64xf32> to vector<8x64xbf16>
    %cst_50 = arith.constant dense<0.000000e+00> : vector<8x256xf32>
    %95 = tpu.matmul %94, %47, %cst_50 {dimension_numbers = #tpu.dot_dimension_numbers<[1], [0], [0], [1], [0, 0, 1, 1], [], []>} : vector<8x64xbf16>, vector<64x256xbf16>, vector<8x256xf32> -> vector<8x256xf32>
    %96 = arith.addf %93, %95 : vector<8x256xf32>
    %97 = vector.extract_strided_slice %96 {offsets = [0, 0], sizes = [8, 192], strides = [1, 1]} : vector<8x256xf32> to vector<8x192xf32>
    %98 = arith.negf %97 : vector<8x192xf32>
    %99 = math.exp %98 : vector<8x192xf32>
    %cst_51 = arith.constant 1.000000e+00 : f32
    %100 = vector.broadcast %cst_51 : f32 to vector<8x192xf32>
    %101 = arith.addf %100, %99 : vector<8x192xf32>
    %102 = arith.divf %100, %101 : vector<8x192xf32>
    %103 = vector.extract_strided_slice %102 {offsets = [0, 0], sizes = [8, 64], strides = [1, 1]} : vector<8x192xf32> to vector<8x64xf32>
    %104 = vector.extract_strided_slice %102 {offsets = [0, 64], sizes = [8, 64], strides = [1, 1]} : vector<8x192xf32> to vector<8x64xf32>
    %105 = vector.extract_strided_slice %102 {offsets = [0, 128], sizes = [8, 64], strides = [1, 1]} : vector<8x192xf32> to vector<8x64xf32>
    %106 = vector.extract_strided_slice %96 {offsets = [0, 192], sizes = [8, 64], strides = [1, 1]} : vector<8x256xf32> to vector<8x64xf32>
    %107 = math.tanh %106 : vector<8x64xf32>
    %108 = arith.mulf %104, %89 : vector<8x64xf32>
    %109 = arith.mulf %103, %107 : vector<8x64xf32>
    %110 = arith.addf %108, %109 : vector<8x64xf32>
    %111 = math.tanh %110 : vector<8x64xf32>
    %112 = arith.mulf %105, %111 : vector<8x64xf32>
    %c3_52 = arith.constant 3 : index
    %c0_53 = arith.constant 0 : index
    %c0_54 = arith.constant 0 : index
    %113 = vector.load %arg21[%c3_52, %c0_53, %c0_54] : memref<5x8x256xf32, #tpu.memory_space<vmem>>, vector<1x8x256xf32>
    %114 = vector.shape_cast %113 : vector<1x8x256xf32> to vector<8x256xf32>
    %115 = arith.truncf %112 : vector<8x64xf32> to vector<8x64xbf16>
    %cst_55 = arith.constant dense<0.000000e+00> : vector<8x256xf32>
    %116 = tpu.matmul %115, %47, %cst_55 {dimension_numbers = #tpu.dot_dimension_numbers<[1], [0], [0], [1], [0, 0, 1, 1], [], []>} : vector<8x64xbf16>, vector<64x256xbf16>, vector<8x256xf32> -> vector<8x256xf32>
    %117 = arith.addf %114, %116 : vector<8x256xf32>
    %118 = vector.extract_strided_slice %117 {offsets = [0, 0], sizes = [8, 192], strides = [1, 1]} : vector<8x256xf32> to vector<8x192xf32>
    %119 = arith.negf %118 : vector<8x192xf32>
    %120 = math.exp %119 : vector<8x192xf32>
    %cst_56 = arith.constant 1.000000e+00 : f32
    %121 = vector.broadcast %cst_56 : f32 to vector<8x192xf32>
    %122 = arith.addf %121, %120 : vector<8x192xf32>
    %123 = arith.divf %121, %122 : vector<8x192xf32>
    %124 = vector.extract_strided_slice %123 {offsets = [0, 0], sizes = [8, 64], strides = [1, 1]} : vector<8x192xf32> to vector<8x64xf32>
    %125 = vector.extract_strided_slice %123 {offsets = [0, 64], sizes = [8, 64], strides = [1, 1]} : vector<8x192xf32> to vector<8x64xf32>
    %126 = vector.extract_strided_slice %123 {offsets = [0, 128], sizes = [8, 64], strides = [1, 1]} : vector<8x192xf32> to vector<8x64xf32>
    %127 = vector.extract_strided_slice %117 {offsets = [0, 192], sizes = [8, 64], strides = [1, 1]} : vector<8x256xf32> to vector<8x64xf32>
    %128 = math.tanh %127 : vector<8x64xf32>
    %129 = arith.mulf %125, %110 : vector<8x64xf32>
    %130 = arith.mulf %124, %128 : vector<8x64xf32>
    %131 = arith.addf %129, %130 : vector<8x64xf32>
    %132 = math.tanh %131 : vector<8x64xf32>
    %133 = arith.mulf %126, %132 : vector<8x64xf32>
    %c4_57 = arith.constant 4 : index
    %c0_58 = arith.constant 0 : index
    %c0_59 = arith.constant 0 : index
    %134 = vector.load %arg21[%c4_57, %c0_58, %c0_59] : memref<5x8x256xf32, #tpu.memory_space<vmem>>, vector<1x8x256xf32>
    %135 = vector.shape_cast %134 : vector<1x8x256xf32> to vector<8x256xf32>
    %136 = arith.truncf %133 : vector<8x64xf32> to vector<8x64xbf16>
    %cst_60 = arith.constant dense<0.000000e+00> : vector<8x256xf32>
    %137 = tpu.matmul %136, %47, %cst_60 {dimension_numbers = #tpu.dot_dimension_numbers<[1], [0], [0], [1], [0, 0, 1, 1], [], []>} : vector<8x64xbf16>, vector<64x256xbf16>, vector<8x256xf32> -> vector<8x256xf32>
    %138 = arith.addf %135, %137 : vector<8x256xf32>
    %139 = vector.extract_strided_slice %138 {offsets = [0, 0], sizes = [8, 192], strides = [1, 1]} : vector<8x256xf32> to vector<8x192xf32>
    %140 = arith.negf %139 : vector<8x192xf32>
    %141 = math.exp %140 : vector<8x192xf32>
    %cst_61 = arith.constant 1.000000e+00 : f32
    %142 = vector.broadcast %cst_61 : f32 to vector<8x192xf32>
    %143 = arith.addf %142, %141 : vector<8x192xf32>
    %144 = arith.divf %142, %143 : vector<8x192xf32>
    %145 = vector.extract_strided_slice %144 {offsets = [0, 0], sizes = [8, 64], strides = [1, 1]} : vector<8x192xf32> to vector<8x64xf32>
    %146 = vector.extract_strided_slice %144 {offsets = [0, 64], sizes = [8, 64], strides = [1, 1]} : vector<8x192xf32> to vector<8x64xf32>
    %147 = vector.extract_strided_slice %144 {offsets = [0, 128], sizes = [8, 64], strides = [1, 1]} : vector<8x192xf32> to vector<8x64xf32>
    %148 = vector.extract_strided_slice %138 {offsets = [0, 192], sizes = [8, 64], strides = [1, 1]} : vector<8x256xf32> to vector<8x64xf32>
    %149 = math.tanh %148 : vector<8x64xf32>
    %150 = arith.mulf %146, %131 : vector<8x64xf32>
    %151 = arith.mulf %145, %149 : vector<8x64xf32>
    %152 = arith.addf %150, %151 : vector<8x64xf32>
    %153 = math.tanh %152 : vector<8x64xf32>
    %154 = arith.mulf %147, %153 : vector<8x64xf32>
    %155 = arith.truncf %154 : vector<8x64xf32> to vector<8x64xbf16>
    %c0_62 = arith.constant 0 : index
    %c0_63 = arith.constant 0 : index
    %156 = vector.load %arg12[%c0_62, %c0_63] : memref<64x128xbf16, #tpu.memory_space<vmem>>, vector<64x128xbf16>
    %cst_64 = arith.constant dense<0.000000e+00> : vector<8x128xf32>
    %157 = tpu.matmul %155, %156, %cst_64 {dimension_numbers = #tpu.dot_dimension_numbers<[1], [0], [0], [1], [0, 0, 1, 1], [], []>} : vector<8x64xbf16>, vector<64x128xbf16>, vector<8x128xf32> -> vector<8x128xf32>
    %c0_65 = arith.constant 0 : index
    %c0_66 = arith.constant 0 : index
    %158 = vector.load %arg13[%c0_65, %c0_66] : memref<1x128xf32, #tpu.memory_space<vmem>>, vector<1x128xf32>
    %159 = vector.broadcast %158 : vector<1x128xf32> to vector<8x128xf32>
    %160 = arith.addf %157, %159 : vector<8x128xf32>
    %c0_67 = arith.constant 0 : index
    %c0_68 = arith.constant 0 : index
    %161 = vector.load %arg19[%c0_67, %c0_68] : memref<8x128xf32, #tpu.memory_space<vmem>>, vector<8x128xf32>
    tpu.vector_store %arg19[%c0_67, %c0_68], %160 {strides = array<i32>} : memref<8x128xf32, #tpu.memory_space<vmem>>, vector<8x128xf32>,
    %c0_69 = arith.constant 0 : index
    %c0_70 = arith.constant 0 : index
    %162 = vector.load %arg1[%c0_69, %c0_70] : memref<8x8xi32, #tpu.memory_space<vmem>>, vector<8x8xi32>
    %c0_71 = arith.constant 0 : index
    %c0_72 = arith.constant 0 : index
    %163 = vector.load %arg2[%c0_71, %c0_72] : memref<8x8xf32, #tpu.memory_space<vmem>>, vector<8x8xf32>
    %cst_73 = arith.constant dense<0.000000e+00> : vector<8xf32>
    %164 = vector.multi_reduction <add>, %163, %cst_73 [1] : vector<8x8xf32> to vector<8xf32>
    %165 = vector.shape_cast %164 : vector<8xf32> to vector<8x1xf32>
    %cst_74 = arith.constant 1.000000e+00 : f32
    %166 = vector.broadcast %cst_74 : f32 to vector<8x1xf32>
    %167 = arith.maximumf %165, %166 : vector<8x1xf32>
    %168 = tpu.reciprocal %167 {approx = true} : vector<8x1xf32> -> vector<8x1xf32>
    %169 = tpu.iota {dimensions = array<i32: 2>} : vector<8x8x50xi32>
    %170 = vector.shape_cast %162 : vector<8x8xi32> to vector<8x8x1xi32>
    %171 = vector.broadcast %170 : vector<8x8x1xi32> to vector<8x8x50xi32>
    %172 = arith.cmpi eq, %171, %169 : vector<8x8x50xi32>
    %173 = arith.extui %172 : vector<8x8x50xi1> to vector<8x8x50xi32>
    %174 = arith.sitofp %173 : vector<8x8x50xi32> to vector<8x8x50xf32>
    %175 = vector.shape_cast %163 : vector<8x8xf32> to vector<8x8x1xf32>
    %176 = vector.broadcast %175 : vector<8x8x1xf32> to vector<8x8x50xf32>
    %177 = arith.mulf %174, %176 : vector<8x8x50xf32>
    %cst_75 = arith.constant dense<0.000000e+00> : vector<8x50xf32>
    %178 = vector.multi_reduction <add>, %177, %cst_75 [1] : vector<8x8x50xf32> to vector<8x50xf32>
    %179 = vector.broadcast %168 : vector<8x1xf32> to vector<8x50xf32>
    %180 = arith.mulf %178, %179 : vector<8x50xf32>
    %181 = arith.truncf %180 : vector<8x50xf32> to vector<8x50xbf16>
    %c0_76 = arith.constant 0 : index
    %c0_77 = arith.constant 0 : index
    %182 = vector.load %arg6[%c0_76, %c0_77] : memref<50x32xbf16, #tpu.memory_space<vmem>>, vector<50x32xbf16>
    %cst_78 = arith.constant dense<0.000000e+00> : vector<8x32xf32>
    %183 = tpu.matmul %181, %182, %cst_78 {dimension_numbers = #tpu.dot_dimension_numbers<[1], [0], [0], [1], [0, 0, 1, 1], [], []>} : vector<8x50xbf16>, vector<50x32xbf16>, vector<8x32xf32> -> vector<8x32xf32>
    %184 = arith.truncf %183 : vector<8x32xf32> to vector<8x32xbf16>
    %c0_79 = arith.constant 0 : index
    %c0_80 = arith.constant 0 : index
    %185 = vector.load %arg7[%c0_79, %c0_80] : memref<32x32xbf16, #tpu.memory_space<vmem>>, vector<32x32xbf16>
    %cst_81 = arith.constant dense<0.000000e+00> : vector<8x32xf32>
    %186 = tpu.matmul %184, %185, %cst_81 {dimension_numbers = #tpu.dot_dimension_numbers<[1], [0], [0], [1], [0, 0, 1, 1], [], []>} : vector<8x32xbf16>, vector<32x32xbf16>, vector<8x32xf32> -> vector<8x32xf32>
    %c0_82 = arith.constant 0 : index
    %c0_83 = arith.constant 0 : index
    %187 = vector.load %arg8[%c0_82, %c0_83] : memref<1x32xf32, #tpu.memory_space<vmem>>, vector<1x32xf32>
    %188 = vector.broadcast %187 : vector<1x32xf32> to vector<8x32xf32>
    %189 = arith.addf %186, %188 : vector<8x32xf32>
    %190 = math.tanh %189 : vector<8x32xf32>
    %c0_84 = arith.constant 0 : index
    %c0_85 = arith.constant 0 : index
    %191 = vector.load %arg4[%c0_84, %c0_85] : memref<8x1xi32, #tpu.memory_space<vmem>>, vector<8x1xi32>
    %192 = tpu.iota {dimensions = array<i32: 1>} : vector<8x128xi32>
    %193 = vector.broadcast %191 : vector<8x1xi32> to vector<8x128xi32>
    %194 = arith.cmpi eq, %192, %193 : vector<8x128xi32>
    %c0_i32 = arith.constant 0 : i32
    %195 = vector.broadcast %c0_i32 : i32 to vector<8x1xi32>
    %196 = arith.cmpi sge, %191, %195 : vector<8x1xi32>
    %197 = vector.broadcast %196 : vector<8x1xi1> to vector<8x128xi1>
    %198 = arith.andi %194, %197 : vector<8x128xi1>
    %cst_86 = arith.constant 0.000000e+00 : f32
    %199 = vector.broadcast %cst_86 : f32 to vector<8x128xf32>
    %200 = arith.select %198, %160, %199 : vector<8x128xi1>, vector<8x128xf32>
    %cst_87 = arith.constant dense<0.000000e+00> : vector<8xf32>
    %201 = vector.multi_reduction <add>, %200, %cst_87 [1] : vector<8x128xf32> to vector<8xf32>
    %202 = vector.shape_cast %201 : vector<8xf32> to vector<8x1xf32>
    %c0_88 = arith.constant 0 : index
    %c0_89 = arith.constant 0 : index
    %c0_90 = arith.constant 0 : index
    %203 = vector.load %arg3[%c0_88, %c0_89, %c0_90] : memref<5x8x10xf32, #tpu.memory_space<vmem>>, vector<1x8x10xf32>
    %204 = vector.shape_cast %203 : vector<1x8x10xf32> to vector<8x10xf32>
    %205 = vector.extract_strided_slice %204 {offsets = [0, 0], sizes = [8, 7], strides = [1, 1]} : vector<8x10xf32> to vector<8x7xf32>
    %206 = arith.truncf %190 : vector<8x32xf32> to vector<8x32xbf16>
    %c0_91 = arith.constant 0 : index
    %c0_92 = arith.constant 0 : index
    %207 = vector.load %arg14[%c0_91, %c0_92] : memref<32x128xbf16, #tpu.memory_space<vmem>>, vector<32x128xbf16>
    %cst_93 = arith.constant dense<0.000000e+00> : vector<8x128xf32>
    %208 = tpu.matmul %206, %207, %cst_93 {dimension_numbers = #tpu.dot_dimension_numbers<[1], [0], [0], [1], [0, 0, 1, 1], [], []>} : vector<8x32xbf16>, vector<32x128xbf16>, vector<8x128xf32> -> vector<8x128xf32>
    %209 = arith.truncf %205 : vector<8x7xf32> to vector<8x7xbf16>
    %c0_94 = arith.constant 0 : index
    %c0_95 = arith.constant 0 : index
    %210 = vector.load %arg15[%c0_94, %c0_95] : memref<7x128xbf16, #tpu.memory_space<vmem>>, vector<7x128xbf16>
    %cst_96 = arith.constant dense<0.000000e+00> : vector<8x128xf32>
    %211 = tpu.matmul %209, %210, %cst_96 {dimension_numbers = #tpu.dot_dimension_numbers<[1], [0], [0], [1], [0, 0, 1, 1], [], []>} : vector<8x7xbf16>, vector<7x128xbf16>, vector<8x128xf32> -> vector<8x128xf32>
    %212 = arith.addf %208, %211 : vector<8x128xf32>
    %c0_97 = arith.constant 0 : index
    %c0_98 = arith.constant 0 : index
    %213 = vector.load %arg16[%c0_97, %c0_98] : memref<1x128xf32, #tpu.memory_space<vmem>>, vector<1x128xf32>
    %214 = vector.broadcast %202 : vector<8x1xf32> to vector<8x128xf32>
    %215 = vector.broadcast %213 : vector<1x128xf32> to vector<8x128xf32>
    %216 = arith.mulf %214, %215 : vector<8x128xf32>
    %217 = arith.addf %212, %216 : vector<8x128xf32>
    %c0_99 = arith.constant 0 : index
    %c0_100 = arith.constant 0 : index
    %218 = vector.load %arg5[%c0_99, %c0_100] : memref<8x1xf32, #tpu.memory_space<vmem>>, vector<8x1xf32>
    %c0_101 = arith.constant 0 : index
    %c0_102 = arith.constant 0 : index
    %219 = vector.load %arg17[%c0_101, %c0_102] : memref<1x128xf32, #tpu.memory_space<vmem>>, vector<1x128xf32>
    %220 = vector.broadcast %218 : vector<8x1xf32> to vector<8x128xf32>
    %221 = vector.broadcast %219 : vector<1x128xf32> to vector<8x128xf32>
    %222 = arith.mulf %220, %221 : vector<8x128xf32>
    %223 = arith.addf %217, %222 : vector<8x128xf32>
    %c0_103 = arith.constant 0 : index
    %c0_104 = arith.constant 0 : index
    %224 = vector.load %arg18[%c0_103, %c0_104] : memref<1x128xf32, #tpu.memory_space<vmem>>, vector<1x128xf32>
    %225 = vector.broadcast %224 : vector<1x128xf32> to vector<8x128xf32>
    %226 = arith.addf %223, %225 : vector<8x128xf32>
    %c0_105 = arith.constant 0 : index
    %c0_106 = arith.constant 0 : index
    %227 = vector.load %arg20[%c0_105, %c0_106] : memref<8x128xf32, #tpu.memory_space<vmem>>, vector<8x128xf32>
    tpu.vector_store %arg20[%c0_105, %c0_106], %226 {strides = array<i32>} : memref<8x128xf32, #tpu.memory_space<vmem>>, vector<8x128xf32>,
    return
  }
  func.func @transform_0(%arg0: i32) -> (i32, i32) {
    %c0_i32 = arith.constant 0 : i32
    %c0_i32_0 = arith.constant 0 : i32
    return %arg0, %c0_i32 : i32, i32
  }
  func.func @transform_1(%arg0: i32) -> (i32, i32) {
    %c0_i32 = arith.constant 0 : i32
    %c0_i32_0 = arith.constant 0 : i32
    return %arg0, %c0_i32 : i32, i32
  }
  func.func @transform_2(%arg0: i32) -> (i32, i32, i32) {
    %c0_i32 = arith.constant 0 : i32
    %c0_i32_0 = arith.constant 0 : i32
    %c0_i32_1 = arith.constant 0 : i32
    return %c0_i32, %arg0, %c0_i32_0 : i32, i32, i32
  }
  func.func @transform_3(%arg0: i32) -> (i32, i32) {
    %c0_i32 = arith.constant 0 : i32
    %c0_i32_0 = arith.constant 0 : i32
    return %arg0, %c0_i32 : i32, i32
  }
  func.func @transform_4(%arg0: i32) -> (i32, i32) {
    %c0_i32 = arith.constant 0 : i32
    %c0_i32_0 = arith.constant 0 : i32
    return %arg0, %c0_i32 : i32, i32
  }
  func.func @transform_5(%arg0: i32) -> (i32, i32) {
    %c0_i32 = arith.constant 0 : i32
    %c0_i32_0 = arith.constant 0 : i32
    %c0_i32_1 = arith.constant 0 : i32
    return %c0_i32, %c0_i32_0 : i32, i32
  }
  func.func @transform_6(%arg0: i32) -> (i32, i32) {
    %c0_i32 = arith.constant 0 : i32
    %c0_i32_0 = arith.constant 0 : i32
    %c0_i32_1 = arith.constant 0 : i32
    return %c0_i32, %c0_i32_0 : i32, i32
  }
  func.func @transform_7(%arg0: i32) -> (i32, i32) {
    %c0_i32 = arith.constant 0 : i32
    %c0_i32_0 = arith.constant 0 : i32
    %c0_i32_1 = arith.constant 0 : i32
    return %c0_i32, %c0_i32_0 : i32, i32
  }
  func.func @transform_8(%arg0: i32) -> (i32, i32) {
    %c0_i32 = arith.constant 0 : i32
    %c0_i32_0 = arith.constant 0 : i32
    %c0_i32_1 = arith.constant 0 : i32
    return %c0_i32, %c0_i32_0 : i32, i32
  }
  func.func @transform_9(%arg0: i32) -> (i32, i32) {
    %c0_i32 = arith.constant 0 : i32
    %c0_i32_0 = arith.constant 0 : i32
    %c0_i32_1 = arith.constant 0 : i32
    return %c0_i32, %c0_i32_0 : i32, i32
  }
  func.func @transform_10(%arg0: i32) -> (i32, i32) {
    %c0_i32 = arith.constant 0 : i32
    %c0_i32_0 = arith.constant 0 : i32
    %c0_i32_1 = arith.constant 0 : i32
    return %c0_i32, %c0_i32_0 : i32, i32
  }
  func.func @transform_11(%arg0: i32) -> (i32, i32) {
    %c0_i32 = arith.constant 0 : i32
    %c0_i32_0 = arith.constant 0 : i32
    %c0_i32_1 = arith.constant 0 : i32
    return %c0_i32, %c0_i32_0 : i32, i32
  }
  func.func @transform_12(%arg0: i32) -> (i32, i32) {
    %c0_i32 = arith.constant 0 : i32
    %c0_i32_0 = arith.constant 0 : i32
    %c0_i32_1 = arith.constant 0 : i32
    return %c0_i32, %c0_i32_0 : i32, i32
  }
  func.func @transform_13(%arg0: i32) -> (i32, i32) {
    %c0_i32 = arith.constant 0 : i32
    %c0_i32_0 = arith.constant 0 : i32
    %c0_i32_1 = arith.constant 0 : i32
    return %c0_i32, %c0_i32_0 : i32, i32
  }
  func.func @transform_14(%arg0: i32) -> (i32, i32) {
    %c0_i32 = arith.constant 0 : i32
    %c0_i32_0 = arith.constant 0 : i32
    %c0_i32_1 = arith.constant 0 : i32
    return %c0_i32, %c0_i32_0 : i32, i32
  }
  func.func @transform_15(%arg0: i32) -> (i32, i32) {
    %c0_i32 = arith.constant 0 : i32
    %c0_i32_0 = arith.constant 0 : i32
    %c0_i32_1 = arith.constant 0 : i32
    return %c0_i32, %c0_i32_0 : i32, i32
  }
  func.func @transform_16(%arg0: i32) -> (i32, i32) {
    %c0_i32 = arith.constant 0 : i32
    %c0_i32_0 = arith.constant 0 : i32
    %c0_i32_1 = arith.constant 0 : i32
    return %c0_i32, %c0_i32_0 : i32, i32
  }
  func.func @transform_17(%arg0: i32) -> (i32, i32) {
    %c0_i32 = arith.constant 0 : i32
    %c0_i32_0 = arith.constant 0 : i32
    %c0_i32_1 = arith.constant 0 : i32
    return %c0_i32, %c0_i32_0 : i32, i32
  }
  func.func @transform_18(%arg0: i32) -> (i32, i32) {
    %c0_i32 = arith.constant 0 : i32
    %c0_i32_0 = arith.constant 0 : i32
    return %arg0, %c0_i32 : i32, i32
  }
  func.func @transform_19(%arg0: i32) -> (i32, i32) {
    %c0_i32 = arith.constant 0 : i32
    %c0_i32_0 = arith.constant 0 : i32
    return %arg0, %c0_i32 : i32, i32
  }
}

</mosaic_0001>

<bundles_post_ra>
// kernel: tpu_custom_call.1
= control target key start
LH: loop header
LB: loop body
LE: loop exit
PB: predicated region body
PF: predicated region fallthrough
CT: control target
= control target key end

     0   :  { %s2586_s0 = inlined_call_operand.hbm [shape: s32[8,8], index: 0, kind: input, shape index: {}]   ;;  %s2587_s1 = inlined_call_operand.hbm [shape: f32[8,8], index: 1, kind: input, shape index: {}]   ;;  %s2588_s2 = inlined_call_operand.hbm [shape: f32[5,8,10], index: 2, kind: input, shape index: {}]   ;;  %s2589_s3 = inlined_call_operand.vmem [shape: s32[8,1], index: 3, kind: input, shape index: {}]   ;;  %s2590_s4 = inlined_call_operand.vmem [shape: f32[8,1], index: 4, kind: input, shape index: {}]   ;;  %s2591_s5 = inlined_call_operand.vmem [shape: bf16[50,32], index: 5, kind: input, shape index: {}]   ;;  %s2592_s6 = inlined_call_operand.hbm [shape: bf16[32,32], index: 6, kind: input, shape index: {}]   ;;  %s2593_s7 = inlined_call_operand.hbm [shape: f32[1,32], index: 7, kind: input, shape index: {}]   ;;  %s2594_s8 = inlined_call_operand.hbm [shape: bf16[10,256], index: 8, kind: input, shape index: {}]   ;;  %s2595_s9 = inlined_call_operand.vmem [shape: bf16[64,256], index: 9, kind: input, shape index: {}]   ;;  %s2596_s10 = inlined_call_operand.vmem [shape: f32[1,256], index: 10, kind: input, shape index: {}]   ;;  %s2597_s11 = inlined_call_operand.vmem [shape: bf16[64,128], index: 11, kind: input, shape index: {}]   ;;  %s2598_s12 = inlined_call_operand.vmem [shape: f32[1,128], index: 12, kind: input, shape index: {}]   ;;  %s2599_s13 = inlined_call_operand.hbm [shape: bf16[32,128], index: 13, kind: input, shape index: {}]   ;;  %s2600_s14 = inlined_call_operand.vmem [shape: bf16[7,128], index: 14, kind: input, shape index: {}]   ;;  %s2601_s15 = inlined_call_operand.vmem [shape: f32[1,128], index: 15, kind: input, shape index: {}]   ;;  %s2602_s16 = inlined_call_operand.vmem [shape: f32[1,128], index: 16, kind: input, shape index: {}]   ;;  %s2603_s17 = inlined_call_operand.vmem [shape: f32[1,128], index: 17, kind: input, shape index: {}]   ;;  %s2604_s18 = inlined_call_operand.hbm [shape: f32[8,128], index: 18, kind: output, shape index: {0}]   ;;  %s2605_s19 = inlined_call_operand.hbm [shape: f32[8,128], index: 19, kind: output, shape index: {1}]  }
   0x1   :  { %2613 = sst [smem:[#allocation24_spill]] %s2586_s0 }
   0x2   :  { %2614 = sst [smem:[#allocation25_spill]] %s2587_s1 }
   0x3   :  { %2615 = sst [smem:[#allocation26_spill]] %s2588_s2 }
   0x4   :  { %2616 = sst [smem:[#allocation27_spill]] %s2589_s3 }
   0x5   :  { %2617 = sst [smem:[#allocation28_spill]] %s2605_s19 }
   0x6   :  { %25 = vsyncpa [#allocation4], 0 }
   0x7   :  { %26 = vsyncpa [#allocation7], 0 }
   0x8   :  { %27 = vsyncpa [#allocation10], 0 }
   0x9   :  { %28 = vsyncpa [#allocation13], 0 }
   0xa   :  { %29 = vsyncpa [#allocation5], 0 }
   0xb   :  { %30 = vsyncpa [#allocation17], 0  ;;  %s2055_s0 = smov [#allocation6]   ;;  %s2056_s20 = smov [#allocation9]  }
   0xc   :  { %s47_s30 = sshll.u32 %s2055_s0, 4  ;;  %s74_s21 = sshll.u32 %s2056_s20, 4  ;;  %s48_s30 = int_to_ptr.vmem [resolvable:$true] %s47_s30  ;;  %s2172_s21 = int_to_ptr.vmem [resolvable:$true] %s74_s21 }
   0xd   :  { %s2618_s2 = sld [smem:[#allocation25_spill]] }
  0x13   :  { %s1845_s23 = scalar_lea.hbm %s2618_s2, 128 }
  0x14   :  { %p1846_p0 = scmp.ne.s32.totalorder %s2618_s2, %s1845_s23  ;;  %p1849_p1 = scmp.lt.u32.totalorder %s1845_s23, %s2618_s2 }
  0x16   :  { %p1851_p2 = pnand %p1849_p1, %p1846_p0 }
  0x18   :  { %1854 = shalt.err (!%p1851_p2)
}
  0x19   :  { %s1855_s27 = scalar_lea.vmem %s48_s30, 128  ;;  %p1860_p4 = scmp.lt.s32.totalorder %s48_s30, %s48_s30 }
  0x1a   :  { %p1856_p3 = scmp.ne.s32.totalorder %s48_s30, %s1855_s27  ;;  %p1861_p5 = scmp.lt.s32.totalorder %s1855_s27, %s1855_s27 }
  0x1c   :  { %p1862_p6 = por %p1861_p5, %p1860_p4 }
  0x1e   :  { %p1863_p7 = pnand %p1862_p6, %p1856_p3 }
  0x20   :  { %1866 = shalt.err (!%p1863_p7)
}
  0x21   :  { %50 = dma.hbm_to_vmem [thread:$0]  %s2618_s2, 128, %s48_s30, [#allocation7]  }
  0x22   :  { %s1867_s1 = scalar_lea.hbm %s2592_s6, 256 }
  0x23   :  { %p1868_p8 = scmp.ne.s32.totalorder %s2592_s6, %s1867_s1  ;;  %p1871_p9 = scmp.lt.u32.totalorder %s1867_s1, %s2592_s6 }
  0x25   :  { %p1873_p10 = pnand %p1871_p9, %p1868_p8 }
  0x27   :  { %1876 = shalt.err (!%p1873_p10)
}
  0x28   :  { %s1877_s3 = scalar_lea.vmem %s2172_s21, 256  ;;  %p1882_p12 = scmp.lt.s32.totalorder %s2172_s21, %s2172_s21 }
  0x29   :  { %p1878_p11 = scmp.ne.s32.totalorder %s2172_s21, %s1877_s3  ;;  %p1883_p13 = scmp.lt.s32.totalorder %s1877_s3, %s1877_s3 }
  0x2b   :  { %p1884_p0 = por %p1883_p13, %p1882_p12 }
  0x2d   :  { %p1885_p1 = pnand %p1884_p0, %p1878_p11 }
  0x2f   :  { %1888 = shalt.err (!%p1885_p1)
}
  0x30   :  { %s2610_s30 = smov 64   ;;  %s2612_s2 = smov 4  }
  0x31   :  { %80 = dma.hbm_to_vmem [thread:$0]  %s2592_s6, 256, %s2172_s21, [#allocation10], %s2610_s30, %s2610_s30, %s2612_s2  }
  0x32   :  { %s2059_s28 = smov [#allocation12]   ;;  %s2060_s0 = smov [#allocation3]  }
  0x33   :  { %s96_s29 = sshll.u32 %s2059_s28, 4  ;;  %s37_s20 = sshll.u32 %s2060_s0, 4  ;;  %s97_s29 = int_to_ptr.vmem [resolvable:$true] %s96_s29  ;;  %s38_s20 = int_to_ptr.vmem [resolvable:$true] %s37_s20 }
  0x34   :  { %s1889_s24 = scalar_lea.hbm %s2594_s8, 256 }
  0x35   :  { %p1890_p2 = scmp.ne.s32.totalorder %s2594_s8, %s1889_s24  ;;  %p1893_p3 = scmp.lt.u32.totalorder %s1889_s24, %s2594_s8 }
  0x37   :  { %p1895_p4 = pnand %p1893_p3, %p1890_p2 }
  0x39   :  { %1898 = shalt.err (!%p1895_p4)
}
  0x3a   :  { %s1899_s6 = scalar_lea.vmem %s97_s29, 256  ;;  %p1904_p6 = scmp.lt.s32.totalorder %s97_s29, %s97_s29 }
  0x3b   :  { %p1900_p5 = scmp.ne.s32.totalorder %s97_s29, %s1899_s6  ;;  %p1905_p7 = scmp.lt.s32.totalorder %s1899_s6, %s1899_s6 }
  0x3d   :  { %p1906_p8 = por %p1905_p7, %p1904_p6 }
  0x3f   :  { %p1907_p9 = pnand %p1906_p8, %p1900_p5 }
  0x41   :  { %1910 = shalt.err (!%p1907_p9)
}
  0x42   :  { %s2061_s21 = smov 128   ;;  %s2062_s26 = smov 8  }
  0x43   :  { %102 = dma.hbm_to_vmem [thread:$0]  %s2594_s8, 256, %s97_s29, [#allocation13], %s2061_s21, %s2061_s21, %s2062_s26  }
  0x44   :  { %s2619_s1 = sld [smem:[#allocation24_spill]] }
  0x4a   :  { %s1911_s22 = scalar_lea.hbm %s2619_s1, 128 }
  0x4b   :  { %p1912_p10 = scmp.ne.s32.totalorder %s2619_s1, %s1911_s22  ;;  %p1915_p11 = scmp.lt.u32.totalorder %s1911_s22, %s2619_s1 }
  0x4d   :  { %p1917_p12 = pnand %p1915_p11, %p1912_p10 }
  0x4f   :  { %1920 = shalt.err (!%p1917_p12)
}
  0x50   :  { %s1921_s6 = scalar_lea.vmem %s38_s20, 128  ;;  %p1926_p0 = scmp.lt.s32.totalorder %s38_s20, %s38_s20 }
  0x51   :  { %p1922_p13 = scmp.ne.s32.totalorder %s38_s20, %s1921_s6  ;;  %p1927_p1 = scmp.lt.s32.totalorder %s1921_s6, %s1921_s6 }
  0x53   :  { %p1928_p2 = por %p1927_p1, %p1926_p0 }
  0x55   :  { %p1929_p3 = pnand %p1928_p2, %p1922_p13 }
  0x57   :  { %1932 = shalt.err (!%p1929_p3)
}
  0x58   :  { %40 = dma.hbm_to_vmem [thread:$0]  %s2619_s1, 128, %s38_s20, [#allocation4]  }
  0x59   :  { %s2063_s27 = smov [#allocation8]   ;;  %s2064_s19 = smov [#allocation11]  }
  0x5a   :  { %s56_s28 = sshll.u32 %s2063_s27, 4  ;;  %s87_s0 = sshll.u32 %s2064_s19, 4  ;;  %s57_s28 = int_to_ptr.vmem [resolvable:$true] %s56_s28  ;;  %s88_s0 = int_to_ptr.vmem [resolvable:$true] %s87_s0 }
  0x5b   :  { %s2620_s23 = sld [smem:[#allocation26_spill]] }
  0x61   :  { %s1933_s25 = scalar_lea.hbm %s2620_s23, 640 }
  0x62   :  { %p1934_p4 = scmp.ne.s32.totalorder %s2620_s23, %s1933_s25  ;;  %p1937_p5 = scmp.lt.u32.totalorder %s1933_s25, %s2620_s23 }
  0x64   :  { %p1939_p6 = pnand %p1937_p5, %p1934_p4 }
  0x66   :  { %1942 = shalt.err (!%p1939_p6)
}
  0x67   :  { %s1943_s20 = scalar_lea.vmem %s57_s28, 640  ;;  %p1948_p8 = scmp.lt.s32.totalorder %s57_s28, %s57_s28 }
  0x68   :  { %p1944_p7 = scmp.ne.s32.totalorder %s57_s28, %s1943_s20  ;;  %p1949_p9 = scmp.lt.s32.totalorder %s1943_s20, %s1943_s20 }
  0x6a   :  { %p1950_p10 = por %p1949_p9, %p1948_p8 }
  0x6c   :  { %p1951_p11 = pnand %p1950_p10, %p1944_p7 }
  0x6e   :  { %1954 = shalt.err (!%p1951_p11)
}
  0x6f   :  { %62 = dma.hbm_to_vmem [thread:$0]  %s2620_s23, 640, %s57_s28, [#allocation7], %s2061_s21, %s2061_s21, %s2062_s26  }
  0x70   :  { %s1955_s2 = scalar_lea.hbm %s2593_s7, 16 }
  0x71   :  { %p1956_p12 = scmp.ne.s32.totalorder %s2593_s7, %s1955_s2  ;;  %p1959_p13 = scmp.lt.u32.totalorder %s1955_s2, %s2593_s7 }
  0x73   :  { %p1961_p0 = pnand %p1959_p13, %p1956_p12 }
  0x75   :  { %1964 = shalt.err (!%p1961_p0)
}
  0x76   :  { %s1965_s25 = scalar_lea.vmem %s88_s0, 16  ;;  %s1969_s3 = scalar_lea.vmem %s88_s0, 32 }
  0x77   :  { %p1966_p1 = scmp.ne.s32.totalorder %s88_s0, %s1965_s25  ;;  %p1970_p2 = scmp.lt.s32.totalorder %s88_s0, %s88_s0 }
  0x78   :  { %p1971_p3 = scmp.lt.s32.totalorder %s1969_s3, %s1965_s25 }
  0x7a   :  { %p1972_p4 = por %p1971_p3, %p1970_p2 }
  0x7c   :  { %p1973_p5 = pnand %p1972_p4, %p1966_p1 }
  0x7e   :  { %1976 = shalt.err (!%p1973_p5)
}
  0x7f   :  { %90 = dma.hbm_to_vmem [thread:$0]  %s2593_s7, 16, %s88_s0, [#allocation10]  }
  0x80   :  { %s2065_s28 = smov [#allocation14]   ;;  %s1977_s1 = scalar_lea.hbm %s2599_s13, 256 }
  0x81   :  { %s116_s23 = sshll.u32 %s2065_s28, 4  ;;  %p1978_p6 = scmp.ne.s32.totalorder %s2599_s13, %s1977_s1  ;;  %s117_s23 = int_to_ptr.vmem [resolvable:$true] %s116_s23 }
  0x82   :  { %p1981_p7 = scmp.lt.u32.totalorder %s1977_s1, %s2599_s13 }
  0x84   :  { %p1983_p8 = pnand %p1981_p7, %p1978_p6 }
  0x86   :  { %1986 = shalt.err (!%p1983_p8)
}
  0x87   :  { %s1987_s27 = scalar_lea.vmem %s117_s23, 256  ;;  %p1992_p10 = scmp.lt.s32.totalorder %s117_s23, %s117_s23 }
  0x88   :  { %p1988_p9 = scmp.ne.s32.totalorder %s117_s23, %s1987_s27  ;;  %p1993_p11 = scmp.lt.s32.totalorder %s1987_s27, %s1987_s27 }
  0x8a   :  { %p1994_p12 = por %p1993_p11, %p1992_p10 }
  0x8c   :  { %p1995_p13 = pnand %p1994_p12, %p1988_p9 }
  0x8e   :  { %1998 = shalt.err (!%p1995_p13)
}
  0x8f   :  { %s2621_s7 = smov 4   ;;  %s2622_s0 = smov 64  }
  0x90   :  { %122 = dma.hbm_to_vmem [thread:$0]  %s2599_s13, 256, %s117_s23, [#allocation13], %s2622_s0, %s2622_s0, %s2621_s7  }
  0x91   :  { %2043 = dma.done.wait [#allocation4], 128  }
  0x92   :  { %2044 = vsyncadd [#allocation4], 4294967168 }
  0x93   :  { %2045 = dma.done.wait [#allocation7], 768  }
  0x94   :  { %2046 = vsyncadd [#allocation7], 4294966528 }
  0x95   :  { %2047 = dma.done.wait [#allocation10], 272  }
  0x96   :  { %2048 = vsyncadd [#allocation10], 4294967024 }
  0x97   :  { %2049 = dma.done.wait [#allocation13], 512  }
  0x98   :  { %2050 = vsyncadd [#allocation13], 4294966784  ;;  %v2066_v0 = vmov 0   ;;  %vm181_vm0 = vcmask 1044480   ;;  %v156_v3 = vld [vmem:[#allocation8] sm:$0xff]  ;;  %vm177_vm1 = vcmask 80896   ;;  %v159_v18 = vlaneseq }
  0x99   :  { %220 = vmatprep.mubr.bf16.mxu0 %v2066_v0  ;;  %269 = vmatprep.mubr.bf16.mxu1 %v2066_v0  ;;  %v1754_v1 = vld [vmem:[#allocation12 + $0x4] ss:$8 sps:$4 sm:$0x1f]   ;;  %v1756_v2 = vld [vmem:[#allocation12] ss:$8 sps:$4 sm:$0x1f]   ;;  %v157_v5 = vpack.c.bf16 %v156_v3, %v156_v3 }
  0x9a   :  { %1753 = vset.pattern.permute.xlu1 %v2066_v0  ;;  %1752 = vset.pattern.permute.xlu0 %v2066_v0  ;;  %v2282_v4 = vsel %vm181_vm0, %v1756_v2, 0  ;;  %v282_v6 = vld [vmem:[#allocation8 + $0x10] sm:$0xff]  ;;  %v382_v9 = vld [vmem:[#allocation8 + $0x20] sm:$0xff]  ;;  %v2357_v19 = vshrl.u32 %v159_v18, 7  ;;  %v232_v38 = vld [vmem:[#allocation8 + $0x8] sm:$0xff]  ;;  %vm481_vm2 = vcmask 523264  }
  0x9b   :  { %1579 = vmatprep.subr.msk.bf16.mxu0 %vm181_vm0, %v1754_v1  ;;  %1581 = vmatprep.subr.msk.bf16.mxu1 %vm181_vm0, %v1754_v1  ;;  %v283_v7 = vpack.c.bf16 %v282_v6, %v282_v6  ;;  %v2295_v8 = vld [vmem:[%s2595_s9 + $0x4] ss:$8 sps:$4 sm:$0xff]   ;;  %v383_v10 = vpack.c.bf16 %v382_v9, %v382_v9  ;;  %v2304_v11 = vld [vmem:[%s2595_s9] ss:$8 sps:$4 sm:$0xff]   ;;  %v2309_v12 = vld [vmem:[%s2595_s9 + $0x14] ss:$8 sps:$4 sm:$0xff]   ;;  %v233_v39 = vpack.c.bf16 %v232_v38, %v232_v38 }
  0x9c   :  { %189 = vmatpush1.bf16.msra.mxu0 %v2282_v4  ;;  %238 = vmatpush1.bf16.msra.mxu1 %v2282_v4  ;;  %v2316_v13 = vld [vmem:[%s2595_s9 + $0x10] ss:$8 sps:$4 sm:$0xff]   ;;  %v2323_v14 = vld [vmem:[%s2595_s9 + $0x24] ss:$8 sps:$4 sm:$0xff]   ;;  %v2329_v15 = vld [vmem:[%s2595_s9 + $0x20] ss:$8 sps:$4 sm:$0xff]  }
  0x9d   :  { %1583 = vmatprep.subr.msk.bf16.mxu0 %vm181_vm0, %v1754_v1  ;;  %1585 = vmatprep.subr.msk.bf16.mxu1 %vm181_vm0, %v1754_v1  ;;  %v2335_v16 = vld [vmem:[%s2595_s9 + $0x34] ss:$8 sps:$4 sm:$0xff]   ;;  %v2341_v17 = vld [vmem:[%s2595_s9 + $0x30] ss:$8 sps:$4 sm:$0xff]   ;;  %v2360_v20 = vsub.s32 1, %v2357_v19  ;;  %v2371_v29 = vsub.s32 0, %v2357_v19 }
  0x9e   :  { %v155_v21 = vld [vmem:[%s2596_s10] sm:$0x3]  ;;  %v332_v40 = vld [vmem:[#allocation8 + $0x18] sm:$0xff]  ;;  %vm960_vm3 = vcmask 64512   ;;  %vm2068_vm4 = vmmov 0   ;;  %s2623_s28 = sld [smem:[#allocation27_spill]] }
  0x9f   :  { %1580 = vmatmul.mubr.msk.bf16.vlgmr.msra.gmra.mrb[0].mxu0 %vm177_vm1, %v157_v5  ;;  %v2366_v22 = vrot.slane %v155_v21, %v2360_v20  ;;  %v2374_v30 = vrot.slane %v155_v21, %v2371_v29  ;;  %1582 = vmatmul.mubr.msk.bf16.vlgmr.msra.gmra.mrb[0].mxu1 %vm177_vm1, %v233_v39  ;;  %v333_v41 = vpack.c.bf16 %v332_v40, %v332_v40  ;;  %vm1112_vm10 = vcmask 408576  }
  0xa0   :  { %288 = vmatpush1.bf16.msra.mxu0 %v2282_v4  ;;  %319 = vmatprep.mubr.bf16.mxu0 %v2066_v0  ;;  %vm1225_vm15 = vcmask 1041409  }
  0xa1   :  { %1587 = vmatprep.subr.msk.bf16.mxu0 %vm181_vm0, %v1754_v1  ;;  %338 = vmatpush1.bf16.msra.mxu1 %v2282_v4  ;;  %vm1228_vm0 = vcmask 1042434  }
  0xa2   :  { %369 = vmatprep.mubr.bf16.mxu1 %v2066_v0  ;;  %564 = vmatprep.subr.bf16.mxu1 %v2295_v8 }
  0xa7   :  { %1584 = vmatmul.mubr.msk.bf16.vlgmr.msra.gmra.mrb[4].mxu0 %vm177_vm1, %v283_v7  ;;  %1586 = vmatmul.mubr.msk.bf16.vlgmr.msra.gmra.mrb[4].mxu1 %vm177_vm1, %v333_v41 }
  0xa8   :  { %388 = vmatpush1.bf16.msra.mxu0 %v2282_v4  ;;  %419 = vmatprep.mubr.bf16.mxu0 %v2066_v0 }
  0xa9   :  { %485 = vmatprep.subr.bf16.mxu0 %v2295_v8  ;;  %565 = vmatpush1.bf16.msra.mxu1 %v2304_v11 }
  0xaa   :  { %596 = vmatprep.mubr.bf16.mxu1 %v2066_v0  ;;  %566 = vmatprep.subr.bf16.mxu1 %v2309_v12 }
  0xad   :  { %567 = vmatpush1.bf16.msra.mxu1 %v2316_v13 }
  0xae   :  { %568 = vmatprep.subr.bf16.mxu1 %v2323_v14 }
  0xaf   :  { %1588 = vmatmul.mubr.msk.bf16.vlgmr.msra.gmra.mrb[8].mxu0 %vm177_vm1, %v383_v10  ;;  %vm1231_vm1 = vcmask 1043459  }
  0xb0   :  { %486 = vmatpush1.bf16.msra.mxu0 %v2304_v11  ;;  %517 = vmatprep.mubr.bf16.mxu0 %v2066_v0 }
  0xb1   :  { %487 = vmatprep.subr.bf16.mxu0 %v2309_v12  ;;  %569 = vmatpush1.bf16.msra.mxu1 %v2329_v15 }
  0xb2   :  { %570 = vmatprep.subr.bf16.mxu1 %v2335_v16 }
  0xb4   :  { %488 = vmatpush1.bf16.msra.mxu0 %v2316_v13 }
  0xb5   :  { %489 = vmatprep.subr.bf16.mxu0 %v2323_v14  ;;  %571 = vmatpush1.bf16.msra.mxu1 %v2341_v17 }
  0xb6   :  { %722 = vmatprep.subr.bf16.mxu1 %v2295_v8 }
  0xb8   :  { %490 = vmatpush1.bf16.msra.mxu0 %v2329_v15 }
  0xb9   :  { %491 = vmatprep.subr.bf16.mxu0 %v2335_v16 }
  0xbc   :  { %492 = vmatpush1.bf16.msra.mxu0 %v2341_v17 }
  0xbd   :  { %643 = vmatprep.subr.bf16.mxu0 %v2295_v8 }
  0xbf   :  { %518 = vmatmul.mubr.bf16.vlgmr.msra.gmra.mrb[0].mxu0 %v2066_v0 }
  0xc0   :  { %644 = vmatpush1.bf16.msra.mxu0 %v2304_v11  ;;  %675 = vmatprep.mubr.bf16.mxu0 %v2066_v0 }
  0xc1   :  { %645 = vmatprep.subr.bf16.mxu0 %v2309_v12 }
  0xc4   :  { %646 = vmatpush1.bf16.msra.mxu0 %v2316_v13 }
  0xc5   :  { %647 = vmatprep.subr.bf16.mxu0 %v2323_v14 }
  0xc8   :  { %648 = vmatpush1.bf16.msra.mxu0 %v2329_v15 }
  0xc9   :  { %649 = vmatprep.subr.bf16.mxu0 %v2335_v16 }
  0xcc   :  { %650 = vmatpush1.bf16.msra.mxu0 %v2341_v17 }
  0xcd   :  { %801 = vmatprep.subr.bf16.mxu0 %v2295_v8 }
 0x192   :  { %v519_v23 = vpop.f32.mrb[0].mxu0 }
 0x193   :  { %v521_v24 = vpop.f32.mrb[1].mxu0  ;;  %v1705_v31 = vadd.f32 %v519_v23, %v2374_v30 }
 0x194   :  { %v1706_v25 = vadd.f32 %v521_v24, %v2366_v22  ;;  %v523_v26 = vpop.f32.mrb[2].mxu0 }
 0x195   :  { %v524_v27 = vpop.f32.mrb[3].mxu0  ;;  %v1597_v32 = vmul.f32 -1.442695, %v1705_v31 }
 0x196   :  { %1781 = vtanh.f32 %v1706_v25  ;;  %v1598_v46 = vmul.f32 -1.442695, %v1706_v25 }
 0x197   :  { %1783 = vpow2.f32 %v1597_v32 }
 0x1a0   :  { %v1782_v28 = vpop.eup %1781 }
 0x1a1   :  { %543 = vrot.lane.b32.xlu0 %v1782_v28, %s2622_s0  ;;  %v1784_v33 = vpop.eup %1783 }
 0x1a2   :  { %v534_v34 = vadd.f32 1.0, %v1784_v33 }
 0x1a4   :  { %1785 = vrcp.f32 %v534_v34 }
 0x1ae   :  { %v1786_v35 = vpop.eup %1785 }
 0x1af   :  { %v541_v42 = vmul.f32 0.0, %v1786_v35 }
 0x213   :  { %v544_v36 = vpop.permute.xlu0 %543 }
 0x214   :  { %v546_v37 = vmul.f32 %v1786_v35, %v544_v36 }
 0x216   :  { %548 = vrot.lane.b32.xlu0 %v546_v37, %s2622_s0 }
 0x288   :  { %v549_v43 = vpop.permute.xlu0 %548 }
 0x289   :  { %v551_v44 = vadd.f32 %v549_v43, %v541_v42 }
 0x28b   :  { %1787 = vtanh.f32 %v551_v44 }
 0x28c   :  { %1789 = vpow2.f32 %v1598_v46 }
 0x295   :  { %v1788_v45 = vpop.eup %1787 }
 0x296   :  { %554 = vrot.lane.b32.xlu1 %v1788_v45, %s2622_s0  ;;  %v1790_v47 = vpop.eup %1789 }
 0x297   :  { %v535_v48 = vadd.f32 1.0, %v1790_v47 }
 0x299   :  { %1791 = vrcp.f32 %v535_v48 }
 0x2a3   :  { %v1792_v49 = vpop.eup %1791 }
 0x308   :  { %v555_v50 = vpop.permute.xlu1 %554 }
 0x309   :  { %v557_v51 = vmul.f32 %v1792_v49, %v555_v50 }
 0x30b   :  { %v560_v52 = vpack.c.bf16 %v557_v51, %v557_v51 }
 0x30d   :  { %1599 = vmatmul.mubr.msk.bf16.vlgmr.msra.gmra.mrb[0].mxu1 %vm481_vm2, %v560_v52 }
 0x30e   :  { %723 = vmatpush1.bf16.msra.mxu1 %v2304_v11  ;;  %754 = vmatprep.mubr.bf16.mxu1 %v2066_v0 }
 0x30f   :  { %724 = vmatprep.subr.bf16.mxu1 %v2309_v12 }
 0x312   :  { %725 = vmatpush1.bf16.msra.mxu1 %v2316_v13 }
 0x313   :  { %726 = vmatprep.subr.bf16.mxu1 %v2323_v14 }
 0x316   :  { %727 = vmatpush1.bf16.msra.mxu1 %v2329_v15 }
 0x317   :  { %728 = vmatprep.subr.bf16.mxu1 %v2335_v16 }
 0x31a   :  { %729 = vmatpush1.bf16.msra.mxu1 %v2341_v17 }
 0x3e0   :  { %v598_v53 = vpop.f32.mrb[0].mxu1 }
 0x3e1   :  { %v600_v54 = vpop.f32.mrb[1].mxu1  ;;  %v1707_v59 = vadd.f32 %v598_v53, %v2374_v30 }
 0x3e2   :  { %v1708_v55 = vadd.f32 %v600_v54, %v2366_v22  ;;  %v602_v56 = vpop.f32.mrb[2].mxu1 }
 0x3e3   :  { %v603_v57 = vpop.f32.mrb[3].mxu1  ;;  %v1600_v60 = vmul.f32 -1.442695, %v1707_v59 }
 0x3e4   :  { %1793 = vtanh.f32 %v1708_v55  ;;  %v1601_v7 = vmul.f32 -1.442695, %v1708_v55 }
 0x3e5   :  { %1795 = vpow2.f32 %v1600_v60 }
 0x3ee   :  { %v1794_v58 = vpop.eup %1793 }
 0x3ef   :  { %622 = vrot.lane.b32.xlu1 %v1794_v58, %s2622_s0  ;;  %v1796_v61 = vpop.eup %1795 }
 0x3f0   :  { %v613_v62 = vadd.f32 1.0, %v1796_v61 }
 0x3f2   :  { %1797 = vrcp.f32 %v613_v62 }
 0x3fc   :  { %v1798_v63 = vpop.eup %1797 }
 0x3fd   :  { %v620_v3 = vmul.f32 %v1798_v63, %v551_v44 }
 0x461   :  { %v623_v1 = vpop.permute.xlu1 %622 }
 0x462   :  { %v625_v2 = vmul.f32 %v1798_v63, %v623_v1 }
 0x464   :  { %627 = vrot.lane.b32.xlu0 %v625_v2, %s2622_s0 }
 0x4d6   :  { %v628_v4 = vpop.permute.xlu0 %627 }
 0x4d7   :  { %v630_v5 = vadd.f32 %v628_v4, %v620_v3 }
 0x4d9   :  { %1799 = vtanh.f32 %v630_v5 }
 0x4da   :  { %1801 = vpow2.f32 %v1601_v7 }
 0x4e3   :  { %v1800_v6 = vpop.eup %1799 }
 0x4e4   :  { %633 = vrot.lane.b32.xlu1 %v1800_v6, %s2622_s0  ;;  %v1802_v8 = vpop.eup %1801 }
 0x4e5   :  { %v614_v9 = vadd.f32 1.0, %v1802_v8 }
 0x4e7   :  { %1803 = vrcp.f32 %v614_v9 }
 0x4f1   :  { %v1804_v10 = vpop.eup %1803 }
 0x556   :  { %v634_v21 = vpop.permute.xlu1 %633 }
 0x557   :  { %v636_v23 = vmul.f32 %v1804_v10, %v634_v21  ;;  %v959_v21 = vld [vmem:[#allocation6] sm:$0xff] }
 0x559   :  { %v639_v24 = vpack.c.bf16 %v636_v23, %v636_v23  ;;  %v961_v23 = vsel %vm960_vm3, %v959_v21, 0.0  ;;  %vm1234_vm3 = vcmask 1044484  }
 0x55b   :  { %1602 = vmatmul.mubr.msk.bf16.vlgmr.msra.gmra.mrb[4].mxu0 %vm481_vm2, %v639_v24  ;;  %v1051_v24 = vrot.slane %v959_v21, %v2371_v29 }
 0x55c   :  { %802 = vmatpush1.bf16.msra.mxu0 %v2304_v11  ;;  %833 = vmatprep.mubr.bf16.mxu0 %v2066_v0 }
 0x55d   :  { %803 = vmatprep.subr.bf16.mxu0 %v2309_v12 }
 0x560   :  { %804 = vmatpush1.bf16.msra.mxu0 %v2316_v13 }
 0x561   :  { %805 = vmatprep.subr.bf16.mxu0 %v2323_v14 }
 0x564   :  { %806 = vmatpush1.bf16.msra.mxu0 %v2329_v15 }
 0x565   :  { %807 = vmatprep.subr.bf16.mxu0 %v2335_v16 }
 0x568   :  { %808 = vmatpush1.bf16.msra.mxu0 %v2341_v17 }
 0x62e   :  { %v677_v25 = vpop.f32.mrb[4].mxu0 }
 0x62f   :  { %v679_v26 = vpop.f32.mrb[5].mxu0  ;;  %v1709_v12 = vadd.f32 %v677_v25, %v2374_v30  ;;  %v1019_v25 = vsub.s32 7, %v2357_v19 }
 0x630   :  { %v1710_v27 = vadd.f32 %v679_v26, %v2366_v22  ;;  %v681_v28 = vpop.f32.mrb[6].mxu0 }
 0x631   :  { %v682_v11 = vpop.f32.mrb[7].mxu0  ;;  %v1603_v13 = vmul.f32 -1.442695, %v1709_v12  ;;  %v1100_v26 = vrot.slane %v959_v21, %v1019_v25 }
 0x632   :  { %1805 = vtanh.f32 %v1710_v27  ;;  %v1604_v37 = vmul.f32 -1.442695, %v1710_v27 }
 0x633   :  { %1807 = vpow2.f32 %v1603_v13  ;;  %v958_v13 = vld [vmem:[#allocation3] sm:$0xff] }
 0x63c   :  { %v1806_v31 = vpop.eup %1805 }
 0x63d   :  { %701 = vrot.lane.b32.xlu0 %v1806_v31, %s2622_s0  ;;  %v1808_v14 = vpop.eup %1807 }
 0x63e   :  { %v692_v15 = vadd.f32 1.0, %v1808_v14 }
 0x640   :  { %1809 = vrcp.f32 %v692_v15  ;;  %v978_v15 = vrot.slane %v958_v13, %v2360_v20 }
 0x64a   :  { %v1810_v16 = vpop.eup %1809 }
 0x64b   :  { %v699_v33 = vmul.f32 %v1810_v16, %v630_v5 }
 0x6af   :  { %v702_v32 = vpop.permute.xlu0 %701 }
 0x6b0   :  { %v704_v17 = vmul.f32 %v1810_v16, %v702_v32  ;;  %v984_v16 = vsub.s32 2, %v2357_v19 }
 0x6b2   :  { %706 = vrot.lane.b32.xlu1 %v704_v17, %s2622_s0  ;;  %v985_v32 = vrot.slane %v958_v13, %v984_v16  ;;  %v2067_v17 = vmov 0.0  }
 0x6b3   :  { %1659 = vmatprep.subr.bf16.mxu1 %v2067_v17  ;;  %1683 = vmatprep.subr.bf16.mxu0 %v2067_v17 }
 0x724   :  { %v707_v34 = vpop.permute.xlu1 %706 }
 0x725   :  { %v709_v35 = vadd.f32 %v707_v34, %v699_v33  ;;  %v991_v33 = vsub.s32 3, %v2357_v19 }
 0x727   :  { %1811 = vtanh.f32 %v709_v35  ;;  %v992_v34 = vrot.slane %v958_v13, %v991_v33 }
 0x728   :  { %1813 = vpow2.f32 %v1604_v37 }
 0x731   :  { %v1812_v36 = vpop.eup %1811 }
 0x732   :  { %712 = vrot.lane.b32.xlu0 %v1812_v36, %s2622_s0  ;;  %v1814_v38 = vpop.eup %1813  ;;  %v998_v36 = vsub.s32 4, %v2357_v19 }
 0x733   :  { %v693_v39 = vadd.f32 1.0, %v1814_v38  ;;  %v1065_v38 = vrot.slane %v959_v21, %v984_v16 }
 0x734   :  { %v999_v37 = vrot.slane %v958_v13, %v998_v36 }
 0x735   :  { %1815 = vrcp.f32 %v693_v39  ;;  %v1005_v39 = vsub.s32 5, %v2357_v19 }
 0x73f   :  { %v1816_v40 = vpop.eup %1815 }
 0x7a4   :  { %v713_v41 = vpop.permute.xlu0 %712 }
 0x7a5   :  { %v715_v42 = vmul.f32 %v1816_v40, %v713_v41  ;;  %v1006_v40 = vrot.slane %v958_v13, %v1005_v39  ;;  %v1072_v41 = vrot.slane %v959_v21, %v991_v33 }
 0x7a7   :  { %v718_v43 = vpack.c.bf16 %v715_v42, %v715_v42 }
 0x7a9   :  { %1605 = vmatmul.mubr.msk.bf16.vlgmr.msra.gmra.mrb[4].mxu1 %vm481_vm2, %v718_v43  ;;  %v1079_v43 = vrot.slane %v959_v21, %v998_v36 }
 0x7aa   :  { %1667 = vmatprep.mubr.msk.bf16.mxu1 %vm2068_vm4, %v2067_v17 }
 0x87c   :  { %v756_v44 = vpop.f32.mrb[4].mxu1 }
 0x87d   :  { %v758_v45 = vpop.f32.mrb[5].mxu1  ;;  %v1711_v50 = vadd.f32 %v756_v44, %v2374_v30  ;;  %v1086_v44 = vrot.slane %v959_v21, %v1005_v39 }
 0x87e   :  { %v1712_v46 = vadd.f32 %v758_v45, %v2366_v22  ;;  %v760_v47 = vpop.f32.mrb[6].mxu1 }
 0x87f   :  { %v761_v48 = vpop.f32.mrb[7].mxu1  ;;  %v1606_v51 = vmul.f32 -1.442695, %v1711_v50  ;;  %v1771_v47 = vld [vmem:[%s2597_s11 + $0x10] sm:$0xff]  }
 0x880   :  { %1817 = vtanh.f32 %v1712_v46  ;;  %v1607_v61 = vmul.f32 -1.442695, %v1712_v46  ;;  %v1769_v46 = vld [vmem:[%s2597_s11] sm:$0xff]  }
 0x881   :  { %1819 = vpow2.f32 %v1606_v51  ;;  %1660 = vmatpush3.bf16.msra.mxu1 %v1769_v46 }
 0x882   :  { %1661 = vmatprep.subr.bf16.mxu1 %v2067_v17 }
 0x88a   :  { %v1818_v49 = vpop.eup %1817 }
 0x88b   :  { %780 = vrot.lane.b32.xlu1 %v1818_v49, %s2622_s0  ;;  %v1820_v52 = vpop.eup %1819  ;;  %v1772_v49 = vld [vmem:[%s2597_s11 + $0x18] sm:$0xff]  }
 0x88c   :  { %v771_v53 = vadd.f32 1.0, %v1820_v52 }
 0x88e   :  { %1821 = vrcp.f32 %v771_v53 }
 0x898   :  { %v1822_v54 = vpop.eup %1821 }
 0x899   :  { %v778_v57 = vmul.f32 %v1822_v54, %v709_v35  ;;  %v1058_v35 = vrot.slane %v959_v21, %v2360_v20  ;;  %v1020_v20 = vrot.slane %v958_v13, %v1019_v25 }
 0x8fd   :  { %v781_v55 = vpop.permute.xlu1 %780 }
 0x8fe   :  { %v783_v56 = vmul.f32 %v1822_v54, %v781_v55  ;;  %v1383_v55 = vld [vmem:[%s2623_s28] sm:$0xff] }
 0x8ff   :  { %vm1388_vm5 = vcmp.ge.s32.totalorder %v1383_v55, 0 }
 0x900   :  { %785 = vrot.lane.b32.xlu0 %v783_v56, %s2622_s0  ;;  %v1389_v56 = vsel %vm1388_vm5, 1, %v2066_v0  ;;  %vm1237_vm5 = vcmask 1045509  }
 0x972   :  { %v786_v58 = vpop.permute.xlu0 %785 }
 0x973   :  { %v2426_v59 = vadd.f32 %v786_v58, %v778_v57 }
 0x975   :  { %1823 = vtanh.f32 %v2426_v59 }
 0x976   :  { %1825 = vpow2.f32 %v1607_v61 }
 0x97f   :  { %v1824_v60 = vpop.eup %1823 }
 0x980   :  { %791 = vrot.lane.b32.xlu1 %v1824_v60, %s2622_s0  ;;  %v1826_v62 = vpop.eup %1825 }
 0x981   :  { %v772_v63 = vadd.f32 1.0, %v1826_v62 }
 0x983   :  { %1827 = vrcp.f32 %v772_v63 }
 0x98d   :  { %v1828_v1 = vpop.eup %1827 }
 0x9f2   :  { %v792_v2 = vpop.permute.xlu1 %791 }
 0x9f3   :  { %v794_v3 = vmul.f32 %v1828_v1, %v792_v2  ;;  %v2477_v2 = vand.u32 127, %v159_v18 }
 0x9f5   :  { %v797_v4 = vpack.c.bf16 %v794_v3, %v794_v3 }
 0x9f7   :  { %1608 = vmatmul.mubr.msk.bf16.vlgmr.msra.gmra.mrb[8].mxu0 %vm481_vm2, %v797_v4 }
 0x9f8   :  { %1687 = vmatprep.mubr.msk.bf16.mxu0 %vm2068_vm4, %v2067_v17 }
 0xaca   :  { %v835_v5 = vpop.f32.mrb[8].mxu0 }
 0xacb   :  { %v837_v6 = vpop.f32.mrb[9].mxu0 }
 0xacc   :  { %v2432_v7 = vadd.f32 %v837_v6, %v2366_v22  ;;  %v839_v8 = vpop.f32.mrb[10].mxu0  ;;  %v1713_v22 = vadd.f32 %v835_v5, %v2374_v30  ;;  %v971_v30 = vrot.slane %v958_v13, %v2371_v29  ;;  %v1012_v29 = vsub.s32 6, %v2357_v19  ;;  %v1770_v19 = vld [vmem:[%s2597_s11 + $0x8] sm:$0xff]  }
 0xacd   :  { %v840_v9 = vpop.f32.mrb[11].mxu0  ;;  %1662 = vmatpush3.bf16.msra.mxu1 %v1770_v19 }
 0xace   :  { %1829 = vtanh.f32 %v2432_v7  ;;  %v1609_v27 = vmul.f32 -1.442695, %v1713_v22  ;;  %v1013_v42 = vrot.slane %v958_v13, %v1012_v29  ;;  %v1093_v45 = vrot.slane %v959_v21, %v1012_v29  ;;  %1663 = vmatprep.subr.bf16.mxu1 %v2067_v17 }
 0xad0   :  { %1831 = vpow2.f32 %v1609_v27 }
 0xad1   :  { %1664 = vmatpush3.bf16.msra.mxu1 %v1771_v47 }
 0xad2   :  { %1665 = vmatprep.subr.bf16.mxu1 %v2067_v17 }
 0xad5   :  { %1666 = vmatpush3.bf16.msra.mxu1 %v1772_v49 }
 0xad6   :  { %1671 = vmatprep.subr.bf16.mxu1 %v2067_v17 }
 0xad8   :  { %v1830_v10 = vpop.eup %1829 }
 0xad9   :  { %859 = vrot.lane.b32.xlu0 %v1830_v10, %s2622_s0 }
 0xada   :  { %v1832_v28 = vpop.eup %1831 }
 0xadb   :  { %v850_v11 = vadd.f32 1.0, %v1832_v28 }
 0xadd   :  { %1833 = vrcp.f32 %v850_v11 }
 0xae7   :  { %v1834_v31 = vpop.eup %1833 }
 0xae8   :  { %v857_v48 = vmul.f32 %v1834_v31, %v2426_v59 }
 0xaf8   :  { %962 = vadd.xlane.f32.xlu0 %v961_v23 }
 0xb0e   :  { %1053 = vbcast.lane.b32.xlu0 %v1051_v24, 256 }
 0xb12   :  { %1102 = vbcast.lane.b32.xlu0 %v1100_v26, 256 }
 0xb16   :  { %1385 = vperm.xlu0 %1752, %v1383_v55  }
 0xb4b   :  { %v860_v12 = vpop.permute.xlu0 %859 }
 0xb4c   :  { %v862_v14 = vmul.f32 %v1834_v31, %v860_v12 }
 0xb4e   :  { %864 = vrot.lane.b32.xlu1 %v862_v14, %s2622_s0 }
 0xb52   :  { %980 = vbcast.lane.b32.xlu1 %v978_v15, 256 }
 0xb56   :  { %987 = vbcast.lane.b32.xlu1 %v985_v32, 256 }
 0xb5a   :  { %973 = vbcast.lane.b32.xlu1 %v971_v30, 256 }
 0xb5e   :  { %994 = vbcast.lane.b32.xlu1 %v992_v34, 256 }
 0xb62   :  { %1060 = vbcast.lane.b32.xlu1 %v1058_v35, 256 }
 0xb66   :  { %1001 = vbcast.lane.b32.xlu1 %v999_v37, 256 }
 0xb6a   :  { %1067 = vbcast.lane.b32.xlu1 %v1065_v38, 256 }
 0xb6e   :  { %1008 = vbcast.lane.b32.xlu1 %v1006_v40, 256 }
 0xb72   :  { %1074 = vbcast.lane.b32.xlu1 %v1072_v41, 256 }
 0xb76   :  { %1015 = vbcast.lane.b32.xlu1 %v1013_v42, 256 }
 0xb7a   :  { %1081 = vbcast.lane.b32.xlu1 %v1079_v43, 256 }
 0xb7e   :  { %1022 = vbcast.lane.b32.xlu1 %v1020_v20, 256  ;;  %v1610_v20 = vmul.f32 -1.442695, %v2432_v7 }
 0xb82   :  { %1088 = vbcast.lane.b32.xlu1 %v1086_v44, 256 }
 0xb85   :  { %v963_v4 = vpop.xlane.xlu0 %962 }
 0xb86   :  { %1095 = vbcast.lane.b32.xlu1 %v1093_v45, 256  ;;  %v964_v15 = vmax.f32 %v963_v4, 1.0 }
 0xb89   :  { %v1054_v9 = vpop.permute.xlu0 %1053 }
 0xb8d   :  { %v1103_v29 = vpop.permute.xlu0 %1102 }
 0xbc0   :  { %v865_v50 = vpop.permute.xlu1 %864 }
 0xbc1   :  { %v867_v51 = vadd.f32 %v865_v50, %v857_v48 }
 0xbc3   :  { %1835 = vtanh.f32 %v867_v51 }
 0xbc4   :  { %v981_v53 = vpop.permute.xlu1 %980  ;;  %1837 = vrcp.f32 %v964_v15 }
 0xbc5   :  { %vm1025_vm6 = vcmp.eq.s32.totalorder %v981_v53, %v2477_v2  ;;  %1839 = vpow2.f32 %v1610_v20 }
 0xbc6   :  { %v1618_v0 = vsel %vm1025_vm6, 1.0, %v2067_v17  ;;  %vm1270_vm6 = vcmask 1040384  }
 0xbc8   :  { %v988_v54 = vpop.permute.xlu1 %987 }
 0xbc9   :  { %vm1026_vm7 = vcmp.eq.s32.totalorder %v988_v54, %v2477_v2 }
 0xbca   :  { %v1619_v6 = vsel %vm1026_vm7, 1.0, %v2067_v17  ;;  %vm1243_vm7 = vcmask 1047559  }
 0xbcc   :  { %v974_v57 = vpop.permute.xlu1 %973 }
 0xbcd   :  { %v1836_v52 = vpop.eup %1835  ;;  %vm1024_vm8 = vcmp.eq.s32.totalorder %v974_v57, %v2477_v2 }
 0xbce   :  { %870 = vrot.lane.b32.xlu1 %v1836_v52, %s2622_s0  ;;  %v1617_v18 = vsel %vm1024_vm8, 1.0, %v2067_v17 }
 0xbcf   :  { %v1104_v24 = vmul.f32 %v1617_v18, %v1054_v9 }
 0xbd0   :  { %v995_v58 = vpop.permute.xlu1 %994 }
 0xbd1   :  { %vm1027_vm9 = vcmp.eq.s32.totalorder %v995_v58, %v2477_v2  ;;  %v1113_v11 = vsel %vm1112_vm10, %v1104_v24, 0.0  ;;  %v2504_v58 = vpop.eup %1837 }
 0xbd2   :  { %1391 = vperm.xlu1 %1753, %v1389_v56   ;;  %v1620_v21 = vsel %vm1027_vm9, 1.0, %v2067_v17  ;;  %v1114_v32 = vrot.slane %v1113_v11, 4  ;;  %v1171_v18 = vrot.slane %v2504_v58, 2 }
 0xbd4   :  { %v1061_v59 = vpop.permute.xlu1 %1060  ;;  %v1115_v39 = vadd.f32 %v1114_v32, %v1113_v11 }
 0xbd5   :  { %v1105_v5 = vmul.f32 %v1618_v0, %v1061_v59 }
 0xbd6   :  { %v1116_v48 = vrot.slane %v1115_v39, 2 }
 0xbd7   :  { %v1120_v23 = vsel %vm1112_vm10, %v1105_v5, 0.0 }
 0xbd8   :  { %v1002_v60 = vpop.permute.xlu1 %1001  ;;  %v1121_v27 = vrot.slane %v1120_v23, 4  ;;  %v1117_v57 = vadd.f32 %v1116_v48, %v1115_v39 }
 0xbd9   :  { %vm1028_vm11 = vcmp.eq.s32.totalorder %v1002_v60, %v2477_v2 }
 0xbda   :  { %v1621_v26 = vsel %vm1028_vm11, 1.0, %v2067_v17  ;;  %v1122_v16 = vadd.f32 %v1121_v27, %v1120_v23  ;;  %v1118_v4 = vrot.slane %v1117_v57, 1  ;;  %vm1338_vm11 = vcmask 261120  }
 0xbdc   :  { %v1068_v61 = vpop.permute.xlu1 %1067  ;;  %v1123_v38 = vrot.slane %v1122_v16, 2  ;;  %v1119_v24 = vadd.f32 %v1118_v4, %v1117_v57 }
 0xbdd   :  { %v1106_v10 = vmul.f32 %v1619_v6, %v1068_v61 }
 0xbde   :  { %v1124_v19 = vadd.f32 %v1123_v38, %v1122_v16  ;;  %v1173_v16 = vrot.slane %v2504_v58, 4 }
 0xbdf   :  { %v1127_v28 = vsel %vm1112_vm10, %v1106_v10, 0.0  ;;  %v1840_v10 = vpop.eup %1839 }
 0xbe0   :  { %v1009_v62 = vpop.permute.xlu1 %1008  ;;  %v1128_v13 = vrot.slane %v1127_v28, 4  ;;  %v1125_v55 = vrot.slane %v1124_v19, 1 }
 0xbe1   :  { %vm1029_vm12 = vcmp.eq.s32.totalorder %v1009_v62, %v2477_v2 }
 0xbe2   :  { %v1622_v12 = vsel %vm1029_vm12, 1.0, %v2067_v17  ;;  %v1129_v37 = vadd.f32 %v1128_v13, %v1127_v28  ;;  %v851_v28 = vadd.f32 1.0, %v1840_v10  ;;  %vm1410_vm12 = vcmask 1042432  }
 0xbe4   :  { %v1075_v63 = vpop.permute.xlu1 %1074  ;;  %v1130_v45 = vrot.slane %v1129_v37, 2  ;;  %1841 = vrcp.f32 %v851_v28  ;;  %v1778_v28 = vld [vmem:[#allocation9 + $0x8] sm:$0xff]  }
 0xbe5   :  { %v1107_v25 = vmul.f32 %v1620_v21, %v1075_v63  ;;  %v1126_v63 = vadd.f32 %v1125_v55, %v1124_v19 }
 0xbe6   :  { %v1131_v52 = vadd.f32 %v1130_v45, %v1129_v37 }
 0xbe7   :  { %v1134_v14 = vsel %vm1112_vm10, %v1107_v25, 0.0 }
 0xbe8   :  { %v1016_v1 = vpop.permute.xlu1 %1015  ;;  %v1135_v35 = vrot.slane %v1134_v14, 4  ;;  %v1132_v61 = vrot.slane %v1131_v52, 1 }
 0xbe9   :  { %vm1030_vm13 = vcmp.eq.s32.totalorder %v1016_v1, %v2477_v2 }
 0xbea   :  { %v1623_v33 = vsel %vm1030_vm13, 1.0, %v2067_v17  ;;  %v1136_v44 = vadd.f32 %v1135_v35, %v1134_v14  ;;  %v1185_v14 = vmul.f32 %v2504_v58, %v1119_v24  ;;  %vm1411_vm13 = vcmask 1043456  }
 0xbec   :  { %v1082_v3 = vpop.permute.xlu1 %1081  ;;  %v1137_v51 = vrot.slane %v1136_v44, 2  ;;  %v1193_v38 = vpack.c.bf16 %v1185_v14, %v1185_v14 }
 0xbed   :  { %v1108_v31 = vmul.f32 %v1621_v26, %v1082_v3  ;;  %v1170_v3 = vrot.slane %v2504_v58, 1 }
 0xbee   :  { %v1138_v59 = vadd.f32 %v1137_v51, %v1136_v44  ;;  %v1216_v45 = vunpack.c.l.b16 %v1193_v38  ;;  %v2069_v38 = vmov 65535  }
 0xbef   :  { %v1141_v36 = vsel %vm1112_vm10, %v1108_v31, 0.0  ;;  %v1186_v23 = vmul.f32 %v1170_v3, %v1126_v63 }
 0xbf0   :  { %v1023_v8 = vpop.permute.xlu1 %1022  ;;  %v1142_v42 = vrot.slane %v1141_v36, 4  ;;  %v1139_v5 = vrot.slane %v1138_v59, 1 }
 0xbf1   :  { %vm1031_vm14 = vcmp.eq.s32.totalorder %v1023_v8, %v2477_v2  ;;  %v1133_v8 = vadd.f32 %v1132_v61, %v1131_v52  ;;  %v1194_v13 = vpack.c.bf16 %v1186_v23, %v1186_v23 }
 0xbf2   :  { %v1624_v41 = vsel %vm1031_vm14, 1.0, %v2067_v17  ;;  %v1143_v50 = vadd.f32 %v1142_v42, %v1141_v36  ;;  %v1140_v26 = vadd.f32 %v1139_v5, %v1138_v59  ;;  %v1174_v36 = vrot.slane %v2504_v58, 5  ;;  %v1774_v5 = vld [vmem:[%s2591_s5 + $0x8] sm:$0xff]  }
 0xbf3   :  { %v1111_v46 = vmul.f32 %v1624_v41, %v1103_v29  ;;  %v1187_v11 = vmul.f32 %v1171_v18, %v1133_v8  ;;  %v1217_v37 = vunpack.c.l.b16 %v1194_v13  ;;  %vm1406_vm14 = vcmask 56320  }
 0xbf4   :  { %v1089_v22 = vpop.permute.xlu1 %1088  ;;  %v1144_v7 = vrot.slane %v1143_v50, 2 }
 0xbf5   :  { %v1109_v30 = vmul.f32 %v1622_v12, %v1089_v22  ;;  %v1162_v54 = vsel %vm1112_vm10, %v1111_v46, 0.0  ;;  %v1172_v22 = vrot.slane %v2504_v58, 3  ;;  %v1224_v44 = vrot.slane %v1217_v37, 7 }
 0xbf6   :  { %v1163_v60 = vrot.slane %v1162_v54, 4  ;;  %v1145_v0 = vadd.f32 %v1144_v7, %v1143_v50 }
 0xbf7   :  { %v1148_v43 = vsel %vm1112_vm10, %v1109_v30, 0.0  ;;  %v1188_v32 = vmul.f32 %v1172_v22, %v1140_v26  ;;  %v1226_v52 = vsel %vm1225_vm15, %v1224_v44, %v1216_v45  ;;  %v1630_v45 = vld [vmem:[#allocation11] ss:$0 sm:$0xff] }
 0xbf8   :  { %v1096_v34 = vpop.permute.xlu1 %1095  ;;  %v1149_v47 = vrot.slane %v1148_v43, 4  ;;  %v1164_v6 = vadd.f32 %v1163_v60, %v1162_v54  ;;  %v1146_v25 = vrot.slane %v1145_v0, 1 }
 0xbf9   :  { %v1110_v40 = vmul.f32 %v1623_v33, %v1096_v34  ;;  %v1195_v33 = vpack.c.bf16 %v1187_v11, %v1187_v11 }
 0xbfa   :  { %v1150_v56 = vadd.f32 %v1149_v47, %v1148_v43  ;;  %v1165_v27 = vrot.slane %v1164_v6, 2  ;;  %v1147_v15 = vadd.f32 %v1146_v25, %v1145_v0  ;;  %v1175_v43 = vrot.slane %v2504_v58, 6 }
 0xbfb   :  { %v1155_v49 = vsel %vm1112_vm10, %v1110_v40, 0.0  ;;  %v1196_v40 = vpack.c.bf16 %v1188_v32, %v1188_v32  ;;  %v1218_v29 = vunpack.c.l.b16 %v1195_v33  ;;  %v1176_v47 = vrot.slane %v2504_v58, 7  ;;  %v1773_v58 = vld [vmem:[%s2591_s5] sm:$0xff]  }
 0xbfc   :  { %v1156_v53 = vrot.slane %v1155_v49, 4  ;;  %v1151_v1 = vrot.slane %v1150_v56, 2  ;;  %v1166_v30 = vadd.f32 %v1165_v27, %v1164_v6  ;;  %v1189_v39 = vmul.f32 %v1173_v16, %v1147_v15  ;;  %v1777_v27 = vld [vmem:[#allocation9] sm:$0xff]  }
 0xbfd   :  { %v1219_v19 = vunpack.c.l.b16 %v1196_v40  ;;  %1684 = vmatpush3.bf16.msra.mxu0 %v1777_v27  ;;  %v1405_v40 = vld [vmem:[%s2600_s14] sm:$0xf] }
 0xbfe   :  { %v1157_v62 = vadd.f32 %v1156_v53, %v1155_v49  ;;  %v1152_v21 = vadd.f32 %v1151_v1, %v1150_v56  ;;  %v1167_v41 = vrot.slane %v1166_v30, 1  ;;  %v1197_v46 = vpack.c.bf16 %v1189_v39, %v1189_v39  ;;  %v1842_v53 = vpop.eup %1841  ;;  %1685 = vmatprep.subr.bf16.mxu0 %v2067_v17 }
 0xbff   :  { %v1227_v49 = vrot.slane %v1218_v29, 6  ;;  %v1230_v55 = vrot.slane %v1219_v19, 5  ;;  %v1412_v39 = vsel %vm1410_vm12, 4294967295, %v2069_v38  ;;  %v1779_v29 = vld [vmem:[#allocation14] sm:$0xff]  }
 0xc00   :  { %v1158_v9 = vrot.slane %v1157_v62, 2  ;;  %v1153_v12 = vrot.slane %v1152_v21, 1  ;;  %v1168_v48 = vadd.f32 %v1167_v41, %v1166_v30  ;;  %v1220_v54 = vunpack.c.l.b16 %v1197_v46 }
 0xc01   :  { %v1229_v7 = vsel %vm1228_vm0, %v1227_v49, %v1226_v52  ;;  %1686 = vmatpush3.bf16.msra.mxu0 %v1778_v28  ;;  %v1413_v41 = vsel %vm1411_vm13, %v1412_v39, 0 }
 0xc02   :  { %v1159_v31 = vadd.f32 %v1158_v9, %v1157_v62  ;;  %v1154_v35 = vadd.f32 %v1153_v12, %v1152_v21  ;;  %v1192_v56 = vmul.f32 %v1176_v47, %v1168_v48  ;;  %v1233_v63 = vrot.slane %v1220_v54, 4  ;;  %v1775_v9 = vld [vmem:[%s2591_s5 + $0x10] sm:$0xff]   ;;  %v1776_v21 = vld [vmem:[%s2591_s5 + $0x18] ss:$0 sps:$4 sm:$0x11]   ;;  %1691 = vmatprep.subr.bf16.mxu0 %v2067_v17 }
 0xc03   :  { %v1232_v1 = vsel %vm1231_vm1, %v1230_v55, %v1229_v7  ;;  %v1272_v25 = vsel %vm1270_vm6, %v1776_v21, 0  ;;  %v1611_v12 = vld [vmem:[%s2598_s12] ss:$0 sm:$0xff] }
 0xc04   :  { %v1160_v34 = vrot.slane %v1159_v31, 1  ;;  %v1190_v20 = vmul.f32 %v1174_v36, %v1154_v35  ;;  %v1200_v3 = vpack.c.bf16 %v1192_v56, %v1192_v56  ;;  %v1235_v6 = vsel %vm1234_vm3, %v1233_v63, %v1232_v1 }
 0xc06   :  { %v1161_v42 = vadd.f32 %v1160_v34, %v1159_v31  ;;  %v1198_v51 = vpack.c.bf16 %v1190_v20, %v1190_v20  ;;  %v1223_v8 = vunpack.c.l.b16 %v1200_v3  ;;  %v1386_v31 = vpop.permute.xlu0 %1385  ;;  %v1780_v20 = vld [vmem:[#allocation14 + $0x8] sm:$0xff]  }
 0xc07   :  { %vm1387_vm9 = vcmp.eq.s32.totalorder %v2477_v2, %v1386_v31  ;;  %v1521_v2 = vld [vmem:[%s2590_s4] sm:$0xff]  ;;  %s2070_s4 = smov [#allocation15]  }
 0xc08   :  { %v1191_v50 = vmul.f32 %v1175_v43, %v1161_v42  ;;  %v1221_v61 = vunpack.c.l.b16 %v1198_v51  ;;  %v1242_v23 = vrot.slane %v1223_v8, 1  ;;  %1525 = vperm.xlu0 %1752, %v1521_v2   ;;  %v1415_v42 = vand.u32 %v1413_v41, %v1405_v40  ;;  %v1398_v43 = vld [vmem:[#allocation8] sm:$0xff]  ;;  %s1551_s14 = sshll.u32 %s2070_s4, 4  ;;  %s1552_s14 = int_to_ptr.vmem [resolvable:$true] %s1551_s14 }
 0xc09   :  { %v1404_v44 = vpack.c.bf16 %v1398_v43, %v1398_v43  ;;  %s1999_s10 = scalar_lea.vmem %s1552_s14, 128  ;;  %p2004_p1 = scmp.lt.s32.totalorder %s1552_s14, %s1552_s14 }
 0xc0a   :  { %v1199_v59 = vpack.c.bf16 %v1191_v50, %v1191_v50  ;;  %v1236_v0 = vrot.slane %v1221_v61, 3  ;;  %p2000_p0 = scmp.ne.s32.totalorder %s1552_s14, %s1999_s10  ;;  %p2005_p2 = scmp.lt.s32.totalorder %s1999_s10, %s1999_s10 }
 0xc0c   :  { %v1222_v4 = vunpack.c.l.b16 %v1199_v59  ;;  %v1238_v10 = vsel %vm1237_vm5, %v1236_v0, %v1235_v6  ;;  %p2006_p3 = por %p2005_p2, %p2004_p1 }
 0xc0e   :  { %v1239_v18 = vrot.slane %v1222_v4, 2  ;;  %p2007_p4 = pnand %p2006_p3, %p2000_p0 }
 0xc40   :  { %v871_v57 = vpop.permute.xlu1 %870 }
 0xc41   :  { %v873_v60 = vmul.f32 %v1842_v53, %v871_v57 }
 0xc43   :  { %v874_v62 = vpack.c.bf16 %v873_v60, %v873_v60 }
 0xc45   :  { %1668 = vmatmul.mubr.msk.bf16.vlgmr.msra.gmra.mrb[8].mxu1 %vm481_vm2, %v874_v62  ;;  %vm1240_vm2 = vcmask 1046534  }
 0xc46   :  { %1672 = vmatpush3.bf16.msra.mxu1 %v1773_v58  ;;  %1679 = vmatprep.mubr.msk.bf16.mxu1 %vm2068_vm4, %v2067_v17  ;;  %v1241_v24 = vsel %vm1240_vm2, %v1239_v18, %v1238_v10 }
 0xc47   :  { %1673 = vmatprep.subr.bf16.mxu1 %v2067_v17  ;;  %v1244_v26 = vsel %vm1243_vm7, %v1242_v23, %v1241_v24 }
 0xc48   :  { %v1245_v22 = vpack.c.b16 %v1244_v26, %v1244_v26 }
 0xc4a   :  { %1674 = vmatpush3.bf16.msra.mxu1 %v1774_v5 }
 0xc4b   :  { %1675 = vmatprep.subr.bf16.mxu1 %v2067_v17 }
 0xc4e   :  { %1676 = vmatpush3.bf16.msra.mxu1 %v1775_v9 }
 0xc4f   :  { %1677 = vmatprep.subr.bf16.mxu1 %v2067_v17 }
 0xc51   :  { %v1392_v11 = vpop.permute.xlu1 %1391 }
 0xc52   :  { %1678 = vmatpush3.bf16.msra.mxu1 %v1272_v25  ;;  %vm1393_vm8 = vcmp.eq.s32.totalorder %v1392_v11, 1 }
 0xc53   :  { %1697 = vmatprep.subr.bf16.mxu1 %v2067_v17 }
 0xc55   :  { %1680 = vmatmul.mubr.msk.bf16.vlgmr.msra.gmra.mrb[12].mxu1 %vm1112_vm10, %v1245_v22  ;;  %vm1394_vm10 = vmand %vm1387_vm9, %vm1393_vm8 }
 0xc56   :  { %1701 = vmatprep.mubr.msk.bf16.mxu1 %vm2068_vm4, %v2067_v17  ;;  %1698 = vmatpush3.bf16.msra.mxu1 %v1779_v29 }
 0xc57   :  { %1699 = vmatprep.subr.bf16.mxu1 %v2067_v17 }
 0xc5a   :  { %1700 = vmatpush3.bf16.msra.mxu1 %v1780_v20 }
 0xd18   :  { %v951_v13 = vpop.f32.mrb[8].mxu1 }
 0xd19   :  { %v952_v14 = vadd.f32 %v1611_v12, %v951_v13  ;;  %v1669_v15 = vpop.f32.mrb[9].mxu1 }
 0xd1a   :  { %v954_v16 = vpop.f32.mrb[10].mxu1 }
 0xd1b   :  { %957 = vst [vmem:[#allocation15] sm:$0xff] %v952_v14  ;;  %v1670_v32 = vpop.f32.mrb[11].mxu1  ;;  %v1395_v30 = vsel %vm1394_vm10, %v952_v14, 0.0 }
 0xd1c   :  { %1396 = vadd.xlane.f32.xlu1 %v1395_v30 }
 0xd28   :  { %v1308_v33 = vpop.f32.mrb[12].mxu1 }
 0xd29   :  { %v1314_v34 = vpack.c.bf16 %v1308_v33, %v1308_v33  ;;  %v1681_v35 = vpop.f32.mrb[13].mxu1 }
 0xd2a   :  { %v1311_v36 = vpop.f32.mrb[14].mxu1 }
 0xd2b   :  { %v1682_v37 = vpop.f32.mrb[15].mxu1  ;;  %1688 = vmatmul.mubr.msk.bf16.vlgmr.msra.gmra.mrb[12].mxu0 %vm1338_vm11, %v1314_v34 }
 0xd2c   :  { %1693 = vmatprep.mubr.msk.bf16.mxu0 %vm2068_vm4, %v2067_v17  ;;  %1692 = vmatpush3.bf16.msra.mxu0 %v1415_v42 }
 0xd33   :  { %1694 = vmatmul.mubr.msk.bf16.vlgmr.msra.gmra.mrb[16].mxu0 %vm1406_vm14, %v1404_v44 }
 0xdfe   :  { %v1376_v46 = vpop.f32.mrb[12].mxu0 }
 0xdff   :  { %v1377_v19 = vadd.f32 %v1630_v45, %v1376_v46  ;;  %v1689_v47 = vpop.f32.mrb[13].mxu0 }
 0xe00   :  { %v1379_v48 = vpop.f32.mrb[14].mxu0 }
 0xe01   :  { %1843 = vtanh.f32 %v1377_v19  ;;  %v1690_v49 = vpop.f32.mrb[15].mxu0 }
 0xe06   :  { %v1451_v52 = vpop.f32.mrb[16].mxu0 }
 0xe07   :  { %v1695_v53 = vpop.f32.mrb[17].mxu0 }
 0xe08   :  { %v1454_v17 = vpop.f32.mrb[18].mxu0 }
 0xe09   :  { %v1696_v54 = vpop.f32.mrb[19].mxu0 }
 0xe0b   :  { %v1844_v50 = vpop.eup %1843 }
 0xe0c   :  { %v1399_v51 = vpack.c.bf16 %v1844_v50, %v1844_v50 }
 0xe0e   :  { %1702 = vmatmul.mubr.msk.bf16.vlgmr.msra.gmra.mrb[16].mxu1 %vm1338_vm11, %v1399_v51 }
 0xe0f   :  { %2010 = shalt.err (!%p2007_p4)
}
 0xe10   :  { %s2011_s13 = scalar_lea.hbm %s2604_s18, 128 }
 0xe11   :  { %p2012_p5 = scmp.ne.s32.totalorder %s2604_s18, %s2011_s13  ;;  %p2015_p6 = scmp.lt.u32.totalorder %s2011_s13, %s2604_s18 }
 0xe13   :  { %p2017_p7 = pnand %p2015_p6, %p2012_p5 }
 0xe15   :  { %2020 = shalt.err (!%p2017_p7)
}
 0xe16   :  { %1554 = dma.vmem_to_hbm [thread:$0]  %s1552_s14, 128, %s2604_s18, [#allocation5]   ;;  %v1638_v55 = vld [vmem:[%s2601_s15] ss:$0 sm:$0xff]  ;;  %v1397_v56 = vpop.xlane.xlu1 %1396  ;;  %v1526_v7 = vpop.permute.xlu0 %1525 }
 0xe17   :  { %v1639_v57 = vld [vmem:[%s2602_s16] ss:$0 sm:$0xff]  ;;  %v1519_v60 = vmul.f32 %v1638_v55, %v1397_v56  ;;  %s2071_s1 = smov [#allocation16]  }
 0xe18   :  { %v1534_v63 = vmul.f32 %v1639_v57, %v1526_v7  ;;  %v1640_v4 = vld [vmem:[%s2603_s17] ss:$0 sm:$0xff]  ;;  %s1561_s15 = sshll.u32 %s2071_s1, 4  ;;  %s1562_s15 = int_to_ptr.vmem [resolvable:$true] %s1561_s15 }
 0xe19   :  { %s2021_s16 = scalar_lea.vmem %s1562_s15, 128  ;;  %p2026_p9 = scmp.lt.s32.totalorder %s1562_s15, %s1562_s15 }
 0xe1a   :  { %p2022_p8 = scmp.ne.s32.totalorder %s1562_s15, %s2021_s16  ;;  %p2027_p10 = scmp.lt.s32.totalorder %s2021_s16, %s2021_s16 }
 0xe1c   :  { %p2028_p11 = por %p2027_p10, %p2026_p9 }
 0xe1e   :  { %p2029_p12 = pnand %p2028_p11, %p2022_p8 }
 0xee1   :  { %v1506_v59 = vpop.f32.mrb[16].mxu1 }
 0xee2   :  { %v1507_v61 = vadd.f32 %v1506_v59, %v1451_v52  ;;  %v1703_v58 = vpop.f32.mrb[17].mxu1 }
 0xee3   :  { %v1509_v62 = vpop.f32.mrb[18].mxu1 }
 0xee4   :  { %v1520_v1 = vadd.f32 %v1519_v60, %v1507_v61  ;;  %v1704_v3 = vpop.f32.mrb[19].mxu1 }
 0xee6   :  { %v1535_v0 = vadd.f32 %v1534_v63, %v1520_v1 }
 0xee8   :  { %v1543_v5 = vadd.f32 %v1640_v4, %v1535_v0 }
 0xeea   :  { %1544 = vst [vmem:[#allocation16] sm:$0xff] %v1543_v5 }
 0xeeb   :  { %2032 = shalt.err (!%p2029_p12)
}
 0xeec   :  { %s2624_s29 = sld [smem:[#allocation28_spill]] }
 0xef2   :  { %s2033_s5 = scalar_lea.hbm %s2624_s29, 128 }
 0xef3   :  { %p2034_p13 = scmp.ne.s32.totalorder %s2624_s29, %s2033_s5  ;;  %p2037_p0 = scmp.lt.u32.totalorder %s2033_s5, %s2624_s29 }
 0xef5   :  { %p2039_p1 = pnand %p2037_p0, %p2034_p13 }
 0xef7   :  { %2042 = shalt.err (!%p2039_p1)
}
 0xef8   :  { %1564 = dma.vmem_to_hbm [thread:$0]  %s1562_s15, 128, %s2624_s29, [#allocation17]  }
 0xef9   :  { %2051 = dma.done.wait [#allocation5], 128  }
 0xefa   :  { %2052 = vsyncadd [#allocation5], 4294967168 }
 0xefb   :  { %2053 = dma.done.wait [#allocation17], 128  }
 0xefc   :  { %2054 = vsyncadd [#allocation17], 4294967168 }
 0xefd   :  { %1571 = vsyncpa [#allocation4], 1 }
 0xefe   :  { %1572 = vsyncpa [#allocation7], 1 }
 0xeff   :  { %1573 = vsyncpa [#allocation10], 1 }
 0xf00   :  { %1574 = vsyncpa [#allocation13], 1 }
 0xf01   :  { %1575 = vsyncpa [#allocation5], 1 }
 0xf02   :  { %1576 = vsyncpa [#allocation17], 1 }

</bundles_post_ra>
